<compile_context>
chip_gen: v7x
topology: tpu7x:2x2x1
jax: 0.10.0
libtpu: 0.0.40
codegen_flags: <defaults>
</compile_context>

<pallas_src>
import functools
import math

import numpy as np
import jax
import jax.numpy as jnp
from jax.experimental import pallas as pl
from jax.experimental.pallas import tpu as pltpu

ACT_DTYPE = jnp.bfloat16  # activation / weight dtype on the MXU paths


def _pick_tile(dim, target, align):
    """Largest tile <= target that divides dim (aligned); full dim if small."""
    if dim <= target:
        return dim
    t = (target // align) * align
    while t >= align:
        if dim % t == 0:
            return t
        t -= align
    return dim  # no aligned divisor: fall back to a single full block


# ---------------------------------------------------------------------------
# Tiled linear (matmul + bias + optional activation epilogue)
# ---------------------------------------------------------------------------
def _matmul_kernel(act, x_ref, w_ref, b_ref, o_ref, acc_ref):
    k = pl.program_id(2)

    @pl.when(k == 0)
    def _():
        acc_ref[...] = jnp.zeros_like(acc_ref)

    acc_ref[...] += jnp.dot(x_ref[...], w_ref[...],
                            preferred_element_type=jnp.float32)

    @pl.when(k == pl.num_programs(2) - 1)
    def _():
        y = acc_ref[...] + b_ref[...].astype(jnp.float32)
        if act == "tanh":
            y = jnp.tanh(y)
        elif act == "gelu":
            # TODO(synk): HF BERT uses exact (erf) GELU; tanh approximation here.
            y = jax.nn.gelu(y, approximate=True)
        o_ref[...] = y.astype(o_ref.dtype)


def linear(x, w, b, act="none", out_dtype=ACT_DTYPE,
           tm_target=256, tn_target=256, tk_target=512):
    """y = act(x @ w + b); x:(M,K) w:(K,N) b:(N,) -> (M,N) in out_dtype."""
    M, K = x.shape
    K2, N = w.shape
    assert K == K2
    tm = _pick_tile(M, tm_target, 8)
    tn = _pick_tile(N, tn_target, 128)
    tk = _pick_tile(K, tk_target, 128)
    grid = (M // tm, N // tn, K // tk)
    bytes_accessed = (M * K * np.dtype(x.dtype).itemsize
                      + K * N * np.dtype(w.dtype).itemsize
                      + M * N * np.dtype(out_dtype).itemsize)
    return pl.pallas_call(
        functools.partial(_matmul_kernel, act),
        out_shape=jax.ShapeDtypeStruct((M, N), out_dtype),
        grid=grid,
        in_specs=[
            pl.BlockSpec((tm, tk), lambda i, j, k: (i, k)),
            pl.BlockSpec((tk, tn), lambda i, j, k: (k, j)),
            pl.BlockSpec((1, tn), lambda i, j, k: (0, j)),
        ],
        out_specs=pl.BlockSpec((tm, tn), lambda i, j, k: (i, j)),
        scratch_shapes=[pltpu.VMEM((tm, tn), jnp.float32)],
        compiler_params=pltpu.CompilerParams(
            dimension_semantics=("parallel", "parallel", "arbitrary"),
            vmem_limit_bytes=32 * 1024 * 1024,
        ),
        cost_estimate=pl.CostEstimate(
            flops=2 * M * N * K, transcendentals=0,
            bytes_accessed=bytes_accessed),
    )(x, w, b.reshape(1, N))


# ---------------------------------------------------------------------------
# Row-tiled LayerNorm (optionally with the residual add fused in)
# ---------------------------------------------------------------------------
def _ln_body(x, g_ref, b_ref, o_ref, eps):
    mu = jnp.mean(x, axis=-1, keepdims=True)
    var = jnp.mean(jnp.square(x - mu), axis=-1, keepdims=True)
    y = (x - mu) * jax.lax.rsqrt(var + eps)
    o_ref[...] = (y * g_ref[...] + b_ref[...]).astype(o_ref.dtype)


def _ln_kernel(eps, x_ref, g_ref, b_ref, o_ref):
    _ln_body(x_ref[...].astype(jnp.float32), g_ref, b_ref, o_ref, eps)


def _add_ln_kernel(eps, x_ref, r_ref, g_ref, b_ref, o_ref):
    x = x_ref[...].astype(jnp.float32) + r_ref[...].astype(jnp.float32)
    _ln_body(x, g_ref, b_ref, o_ref, eps)


def layernorm(x, gamma, beta, residual=None, eps=1e-12,
              out_dtype=ACT_DTYPE, tm_target=256):
    """LayerNorm over last dim (stats in f32); x:(M,H); optional fused residual."""
    M, H = x.shape
    tm = _pick_tile(M, tm_target, 8)
    grid = (M // tm,)
    if residual is None:
        kernel = functools.partial(_ln_kernel, eps)
        operands = (x, gamma, beta)
        in_specs = [
            pl.BlockSpec((tm, H), lambda i: (i, 0)),
            pl.BlockSpec((1, H), lambda i: (0, 0)),
            pl.BlockSpec((1, H), lambda i: (0, 0)),
        ]
    else:
        kernel = functools.partial(_add_ln_kernel, eps)
        operands = (x, residual, gamma, beta)
        in_specs = [
            pl.BlockSpec((tm, H), lambda i: (i, 0)),
            pl.BlockSpec((tm, H), lambda i: (i, 0)),
            pl.BlockSpec((1, H), lambda i: (0, 0)),
            pl.BlockSpec((1, H), lambda i: (0, 0)),
        ]
    return pl.pallas_call(
        kernel,
        out_shape=jax.ShapeDtypeStruct((M, H), out_dtype),
        grid=grid,
        in_specs=in_specs,
        out_specs=pl.BlockSpec((tm, H), lambda i: (i, 0)),
        compiler_params=pltpu.CompilerParams(dimension_semantics=("parallel",)),
    )(*operands)


# ---------------------------------------------------------------------------
# Multi-head self-attention: all heads of one batch element per grid step
# ---------------------------------------------------------------------------
def _attn_kernel(scale, q_ref, k_ref, v_ref, m_ref, o_ref):
    q = q_ref[0]                              # (nH, S, Dh) bf16
    k = k_ref[0]
    v = v_ref[0]
    s = jnp.einsum("hqd,hkd->hqk", q, k,
                   preferred_element_type=jnp.float32) * scale
    s = s + m_ref[0]                          # (1, S) additive mask broadcasts
    s = s - jnp.max(s, axis=-1, keepdims=True)
    p = jnp.exp(s)
    denom = jnp.sum(p, axis=-1, keepdims=True)
    p = p * pl.reciprocal(denom, approx=True)
    o = jnp.einsum("hqk,hkd->hqd", p.astype(v.dtype), v,
                   preferred_element_type=jnp.float32)
    o_ref[0] = o.astype(o_ref.dtype)


def mha_attention(q, k, v, add_mask):
    """q,k,v:(B, nH, S, Dh); add_mask:(B, 1, S) additive (-1e9 on padding)."""
    B, nH, S, Dh = q.shape
    scale = 1.0 / math.sqrt(Dh)
    return pl.pallas_call(
        functools.partial(_attn_kernel, scale),
        out_shape=jax.ShapeDtypeStruct((B, nH, S, Dh), ACT_DTYPE),
        grid=(B,),
        in_specs=[
            pl.BlockSpec((1, nH, S, Dh), lambda b: (b, 0, 0, 0)),
            pl.BlockSpec((1, nH, S, Dh), lambda b: (b, 0, 0, 0)),
            pl.BlockSpec((1, nH, S, Dh), lambda b: (b, 0, 0, 0)),
            pl.BlockSpec((1, 1, S), lambda b: (b, 0, 0)),
        ],
        out_specs=pl.BlockSpec((1, nH, S, Dh), lambda b: (b, 0, 0, 0)),
        compiler_params=pltpu.CompilerParams(dimension_semantics=("parallel",)),
    )(q, k, v, add_mask)


# ---------------------------------------------------------------------------
# Model (gathers / reshapes are XLA glue; all math in Pallas kernels above)
# ---------------------------------------------------------------------------
def encoder_layer(lp, h, add_mask, n_heads):
    B, S, H = h.shape
    Dh = H // n_heads
    x2 = h.reshape(B * S, H)

    # Fused QKV projection: one (H, 3H) matmul instead of three (H, H) ones.
    qkv = linear(x2, lp["wqkv"], lp["bqkv"])                      # (B*S, 3H)
    qkv = qkv.reshape(B, S, 3, n_heads, Dh).transpose(2, 0, 3, 1, 4)
    q, k, v = qkv[0], qkv[1], qkv[2]                              # (B, nH, S, Dh)

    ctx = mha_attention(q, k, v, add_mask)                        # (B, nH, S, Dh)
    ctx = ctx.transpose(0, 2, 1, 3).reshape(B * S, H)

    attn_out = linear(ctx, lp["wo"], lp["bo"])
    h1 = layernorm(attn_out, lp["ln1_g"], lp["ln1_b"], residual=x2)

    ffn = linear(h1, lp["w1"], lp["b1"], act="gelu")
    ffn = linear(ffn, lp["w2"], lp["b2"])
    h2 = layernorm(ffn, lp["ln2_g"], lp["ln2_b"], residual=h1)
    return h2.reshape(B, S, H)


def emotion_classifier_forward(params, input_ids, attention_mask, n_heads):
    B, S = input_ids.shape
    H = params["word_emb"].shape[1]

    # Embeddings (gather is glue) + embedding LayerNorm (Pallas).
    emb = (params["word_emb"][input_ids]
           + params["pos_emb"][jnp.arange(S)][None, :, :]
           + params["type_emb"][0][None, None, :])        # token_type_ids == 0
    h = layernorm(emb.reshape(B * S, H), params["emb_ln_g"], params["emb_ln_b"])
    h = h.reshape(B, S, H)

    # attention_mask (B, S) in {0,1} -> per-batch additive mask (B, 1, S).
    add_mask = ((1.0 - attention_mask.astype(jnp.float32)) * -1e9)[:, None, :]

    for lp in params["layers"]:
        h = encoder_layer(lp, h, add_mask, n_heads)

    # BERT pooler: tanh(W_p @ h[:, 0] + b_p), then classification head.
    pooled = linear(h[:, 0, :], params["pooler_w"], params["pooler_b"], act="tanh")
    logits = linear(pooled, params["fc_w"], params["fc_b"], out_dtype=jnp.float32)
    return logits


# ---------------------------------------------------------------------------
# Deterministic parameter init (matmul weights in bf16, LN / bias in f32)
# ---------------------------------------------------------------------------
def init_params(key, vocab, max_pos, hidden, n_heads, inter, n_layers, n_classes):
    std = 0.02
    keys = list(jax.random.split(key, 8 + n_layers * 8))
    it = iter(keys)

    def w(shape, dtype=ACT_DTYPE):
        return (jax.random.normal(next(it), shape, jnp.float32) * std).astype(dtype)

    params = {
        "word_emb": w((vocab, hidden), jnp.float32),
        "pos_emb": w((max_pos, hidden), jnp.float32),
        "type_emb": w((2, hidden), jnp.float32),
        "emb_ln_g": jnp.ones((1, hidden), jnp.float32),
        "emb_ln_b": jnp.zeros((1, hidden), jnp.float32),
        "pooler_w": w((hidden, hidden)),
        "pooler_b": jnp.zeros((hidden,), jnp.float32),
        "fc_w": w((hidden, n_classes)),
        "fc_b": jnp.zeros((n_classes,), jnp.float32),
        "layers": [],
    }
    for _ in range(n_layers):
        wq, wk, wv = w((hidden, hidden)), w((hidden, hidden)), w((hidden, hidden))
        params["layers"].append({
            "wqkv": jnp.concatenate([wq, wk, wv], axis=1),           # (H, 3H)
            "bqkv": jnp.zeros((3 * hidden,), jnp.float32),
            "wo": w((hidden, hidden)), "bo": jnp.zeros((hidden,), jnp.float32),
            "ln1_g": jnp.ones((1, hidden), jnp.float32),
            "ln1_b": jnp.zeros((1, hidden), jnp.float32),
            "w1": w((hidden, inter)), "b1": jnp.zeros((inter,), jnp.float32),
            "w2": w((inter, hidden)), "b2": jnp.zeros((hidden,), jnp.float32),
            "ln2_g": jnp.ones((1, hidden), jnp.float32),
            "ln2_b": jnp.zeros((1, hidden), jnp.float32),
        })
    return params


# ---------------------------------------------------------------------------
if __name__ == "__main__":
    # Small shapes consistent with the module's forward (hidden scaled down).
    B, S = 2, 8
    VOCAB, MAX_POS = 128, 64
    HIDDEN, N_HEADS, INTER, N_LAYERS = 32, 4, 64, 2
    NUM_CLASSES = 4

    root = jax.random.PRNGKey(0)
    k_params, k_ids = jax.random.split(root)

    params = init_params(k_params, VOCAB, MAX_POS, HIDDEN, N_HEADS, INTER,
                         N_LAYERS, NUM_CLASSES)

    input_ids = jax.random.randint(k_ids, (B, S), 0, VOCAB, dtype=jnp.int32)
    attention_mask = jnp.array(
        [[1, 1, 1, 1, 1, 1, 1, 1],
         [1, 1, 1, 1, 1, 0, 0, 0]], dtype=jnp.int32)

    fwd = jax.jit(functools.partial(emotion_classifier_forward, n_heads=N_HEADS))
    logits = fwd(params, input_ids, attention_mask)
    logits = jax.block_until_ready(logits)

    assert logits.shape == (B, NUM_CLASSES), logits.shape
    assert bool(jnp.all(jnp.isfinite(logits)))
    print("KERNEL_OK")
</pallas_src>

<mosaic_0001>
module attributes {stable_mosaic.version = 11 : i64} {
  func.func @_ln_kernel(%arg0: i32, %arg1: memref<16x32xf32, #tpu.memory_space<vmem>>, %arg2: memref<1x32xf32, #tpu.memory_space<vmem>>, %arg3: memref<1x32xf32, #tpu.memory_space<vmem>>, %arg4: memref<16x32xbf16, #tpu.memory_space<vmem>>) attributes {dimension_semantics = [#tpu.dimension_semantics<parallel>], iteration_bounds = array<i64: 1>, scalar_prefetch = 0 : i64, scratch_operands = 0 : i64, tpu.core_type = #tpu.core_type<tc>, window_params = [{transform_indices = @transform_0, window_bounds = array<i64: 16, 32>}, {pipeline_mode = #tpu.pipeline_mode<synchronous>, transform_indices = @transform_1, window_bounds = array<i64: 1, 32>}, {pipeline_mode = #tpu.pipeline_mode<synchronous>, transform_indices = @transform_2, window_bounds = array<i64: 1, 32>}, {transform_indices = @transform_3, window_bounds = array<i64: 16, 32>}]} {
    %c0 = arith.constant 0 : index
    %c0_0 = arith.constant 0 : index
    %0 = vector.load %arg1[%c0, %c0_0] : memref<16x32xf32, #tpu.memory_space<vmem>>, vector<16x32xf32>
    %cst = arith.constant dense<0.000000e+00> : vector<16xf32>
    %1 = vector.multi_reduction <add>, %0, %cst [1] : vector<16x32xf32> to vector<16xf32>
    %2 = vector.shape_cast %1 : vector<16xf32> to vector<16x1xf32>
    %cst_1 = arith.constant 3.200000e+01 : f32
    %3 = vector.broadcast %cst_1 : f32 to vector<16x1xf32>
    %4 = arith.divf %2, %3 : vector<16x1xf32>
    %5 = vector.broadcast %4 : vector<16x1xf32> to vector<16x32xf32>
    %6 = arith.subf %0, %5 : vector<16x32xf32>
    %7 = arith.mulf %6, %6 : vector<16x32xf32>
    %cst_2 = arith.constant dense<0.000000e+00> : vector<16xf32>
    %8 = vector.multi_reduction <add>, %7, %cst_2 [1] : vector<16x32xf32> to vector<16xf32>
    %9 = vector.shape_cast %8 : vector<16xf32> to vector<16x1xf32>
    %cst_3 = arith.constant 3.200000e+01 : f32
    %10 = vector.broadcast %cst_3 : f32 to vector<16x1xf32>
    %11 = arith.divf %9, %10 : vector<16x1xf32>
    %12 = vector.broadcast %4 : vector<16x1xf32> to vector<16x32xf32>
    %13 = arith.subf %0, %12 : vector<16x32xf32>
    %cst_4 = arith.constant 9.99999996E-13 : f32
    %14 = vector.broadcast %cst_4 : f32 to vector<16x1xf32>
    %15 = arith.addf %11, %14 : vector<16x1xf32>
    %16 = math.rsqrt %15 : vector<16x1xf32>
    %17 = vector.broadcast %16 : vector<16x1xf32> to vector<16x32xf32>
    %18 = arith.mulf %13, %17 : vector<16x32xf32>
    %c0_5 = arith.constant 0 : index
    %c0_6 = arith.constant 0 : index
    %19 = vector.load %arg2[%c0_5, %c0_6] : memref<1x32xf32, #tpu.memory_space<vmem>>, vector<1x32xf32>
    %20 = vector.broadcast %19 : vector<1x32xf32> to vector<16x32xf32>
    %21 = arith.mulf %18, %20 : vector<16x32xf32>
    %c0_7 = arith.constant 0 : index
    %c0_8 = arith.constant 0 : index
    %22 = vector.load %arg3[%c0_7, %c0_8] : memref<1x32xf32, #tpu.memory_space<vmem>>, vector<1x32xf32>
    %23 = vector.broadcast %22 : vector<1x32xf32> to vector<16x32xf32>
    %24 = arith.addf %21, %23 : vector<16x32xf32>
    %25 = arith.truncf %24 : vector<16x32xf32> to vector<16x32xbf16>
    %c0_9 = arith.constant 0 : index
    %c0_10 = arith.constant 0 : index
    %26 = vector.load %arg4[%c0_9, %c0_10] : memref<16x32xbf16, #tpu.memory_space<vmem>>, vector<16x32xbf16>
    tpu.vector_store %arg4[%c0_9, %c0_10], %25 {strides = array<i32>} : memref<16x32xbf16, #tpu.memory_space<vmem>>, vector<16x32xbf16>,
    return
  }
  func.func @transform_0(%arg0: i32) -> (i32, i32) {
    %c0_i32 = arith.constant 0 : i32
    %c0_i32_0 = arith.constant 0 : i32
    return %arg0, %c0_i32 : i32, i32
  }
  func.func @transform_1(%arg0: i32) -> (i32, i32) {
    %c0_i32 = arith.constant 0 : i32
    %c0_i32_0 = arith.constant 0 : i32
    %c0_i32_1 = arith.constant 0 : i32
    return %c0_i32, %c0_i32_0 : i32, i32
  }
  func.func @transform_2(%arg0: i32) -> (i32, i32) {
    %c0_i32 = arith.constant 0 : i32
    %c0_i32_0 = arith.constant 0 : i32
    %c0_i32_1 = arith.constant 0 : i32
    return %c0_i32, %c0_i32_0 : i32, i32
  }
  func.func @transform_3(%arg0: i32) -> (i32, i32) {
    %c0_i32 = arith.constant 0 : i32
    %c0_i32_0 = arith.constant 0 : i32
    return %arg0, %c0_i32 : i32, i32
  }
}

module attributes {stable_mosaic.version = 11 : i64} {
  func.func @_matmul_kernel(%arg0: i32, %arg1: i32, %arg2: i32, %arg3: memref<16x32xbf16, #tpu.memory_space<vmem>>, %arg4: memref<32x96xbf16, #tpu.memory_space<vmem>>, %arg5: memref<1x96xf32, #tpu.memory_space<vmem>>, %arg6: memref<16x96xbf16, #tpu.memory_space<vmem>>, %arg7: memref<16x96xf32, #tpu.memory_space<vmem>>) attributes {dimension_semantics = [#tpu.dimension_semantics<parallel>, #tpu.dimension_semantics<parallel>, #tpu.dimension_semantics<arbitrary>], iteration_bounds = array<i64: 1, 1, 1>, scalar_prefetch = 0 : i64, scratch_operands = 1 : i64, tpu.core_type = #tpu.core_type<tc>, window_params = [{transform_indices = @transform_0, window_bounds = array<i64: 16, 32>}, {transform_indices = @transform_1, window_bounds = array<i64: 32, 96>}, {transform_indices = @transform_2, window_bounds = array<i64: 1, 96>}, {transform_indices = @transform_3, window_bounds = array<i64: 16, 96>}]} {
    %c0_i32 = arith.constant 0 : i32
    %0 = arith.cmpi eq, %arg2, %c0_i32 : i32
    %1 = arith.extui %0 : i1 to i32
    %c0_i32_0 = arith.constant 0 : i32
    %2 = arith.cmpi ne, %1, %c0_i32_0 : i32
    scf.if %2 {
      %cst_10 = arith.constant 0.000000e+00 : f32
      %12 = vector.broadcast %cst_10 : f32 to vector<16x96xf32>
      %c0_11 = arith.constant 0 : index
      %c0_12 = arith.constant 0 : index
      %13 = vector.load %arg7[%c0_11, %c0_12] : memref<16x96xf32, #tpu.memory_space<vmem>>, vector<16x96xf32>
      tpu.vector_store %arg7[%c0_11, %c0_12], %12 {strides = array<i32>} : memref<16x96xf32, #tpu.memory_space<vmem>>, vector<16x96xf32>,
    } else {
    }
    %c0 = arith.constant 0 : index
    %c0_1 = arith.constant 0 : index
    %3 = vector.load %arg7[%c0, %c0_1] : memref<16x96xf32, #tpu.memory_space<vmem>>, vector<16x96xf32>
    %c0_2 = arith.constant 0 : index
    %c0_3 = arith.constant 0 : index
    %4 = vector.load %arg3[%c0_2, %c0_3] : memref<16x32xbf16, #tpu.memory_space<vmem>>, vector<16x32xbf16>
    %c0_4 = arith.constant 0 : index
    %c0_5 = arith.constant 0 : index
    %5 = vector.load %arg4[%c0_4, %c0_5] : memref<32x96xbf16, #tpu.memory_space<vmem>>, vector<32x96xbf16>
    %cst = arith.constant dense<0.000000e+00> : vector<16x96xf32>
    %6 = tpu.matmul %4, %5, %cst {dimension_numbers = #tpu.dot_dimension_numbers<[1], [0], [0], [1], [0, 0, 1, 1], [], []>} : vector<16x32xbf16>, vector<32x96xbf16>, vector<16x96xf32> -> vector<16x96xf32>
    %7 = arith.addf %3, %6 : vector<16x96xf32>
    %c0_6 = arith.constant 0 : index
    %c0_7 = arith.constant 0 : index
    %8 = vector.load %arg7[%c0_6, %c0_7] : memref<16x96xf32, #tpu.memory_space<vmem>>, vector<16x96xf32>
    tpu.vector_store %arg7[%c0_6, %c0_7], %7 {strides = array<i32>} : memref<16x96xf32, #tpu.memory_space<vmem>>, vector<16x96xf32>,
    %c0_i32_8 = arith.constant 0 : i32
    %9 = arith.cmpi eq, %arg2, %c0_i32_8 : i32
    %10 = arith.extui %9 : i1 to i32
    %c0_i32_9 = arith.constant 0 : i32
    %11 = arith.cmpi ne, %10, %c0_i32_9 : i32
    scf.if %11 {
      %c0_10 = arith.constant 0 : index
      %c0_11 = arith.constant 0 : index
      %12 = vector.load %arg7[%c0_10, %c0_11] : memref<16x96xf32, #tpu.memory_space<vmem>>, vector<16x96xf32>
      %c0_12 = arith.constant 0 : index
      %c0_13 = arith.constant 0 : index
      %13 = vector.load %arg5[%c0_12, %c0_13] : memref<1x96xf32, #tpu.memory_space<vmem>>, vector<1x96xf32>
      %14 = vector.broadcast %13 : vector<1x96xf32> to vector<16x96xf32>
      %15 = arith.addf %12, %14 : vector<16x96xf32>
      %16 = arith.truncf %15 : vector<16x96xf32> to vector<16x96xbf16>
      %c0_14 = arith.constant 0 : index
      %c0_15 = arith.constant 0 : index
      %17 = vector.load %arg6[%c0_14, %c0_15] : memref<16x96xbf16, #tpu.memory_space<vmem>>, vector<16x96xbf16>
      tpu.vector_store %arg6[%c0_14, %c0_15], %16 {strides = array<i32>} : memref<16x96xbf16, #tpu.memory_space<vmem>>, vector<16x96xbf16>,
    } else {
    }
    return
  }
  func.func @transform_0(%arg0: i32, %arg1: i32, %arg2: i32) -> (i32, i32) {
    %c0_i32 = arith.constant 0 : i32
    return %arg0, %arg2 : i32, i32
  }
  func.func @transform_1(%arg0: i32, %arg1: i32, %arg2: i32) -> (i32, i32) {
    %c0_i32 = arith.constant 0 : i32
    return %arg2, %arg1 : i32, i32
  }
  func.func @transform_2(%arg0: i32, %arg1: i32, %arg2: i32) -> (i32, i32) {
    %c0_i32 = arith.constant 0 : i32
    %c0_i32_0 = arith.constant 0 : i32
    return %c0_i32, %arg1 : i32, i32
  }
  func.func @transform_3(%arg0: i32, %arg1: i32, %arg2: i32) -> (i32, i32) {
    %c0_i32 = arith.constant 0 : i32
    return %arg0, %arg1 : i32, i32
  }
}

module attributes {stable_mosaic.version = 11 : i64} {
  func.func @_attn_kernel(%arg0: i32, %arg1: memref<1x4x8x8xbf16, #tpu.memory_space<vmem>>, %arg2: memref<1x4x8x8xbf16, #tpu.memory_space<vmem>>, %arg3: memref<1x4x8x8xbf16, #tpu.memory_space<vmem>>, %arg4: memref<1x1x8xf32, #tpu.memory_space<vmem>>, %arg5: memref<1x4x8x8xbf16, #tpu.memory_space<vmem>>) attributes {dimension_semantics = [#tpu.dimension_semantics<parallel>], iteration_bounds = array<i64: 2>, scalar_prefetch = 0 : i64, scratch_operands = 0 : i64, tpu.core_type = #tpu.core_type<tc>, window_params = [{transform_indices = @transform_0, window_bounds = array<i64: 1, 4, 8, 8>}, {transform_indices = @transform_1, window_bounds = array<i64: 1, 4, 8, 8>}, {transform_indices = @transform_2, window_bounds = array<i64: 1, 4, 8, 8>}, {transform_indices = @transform_3, window_bounds = array<i64: 1, 1, 8>}, {transform_indices = @transform_4, window_bounds = array<i64: 1, 4, 8, 8>}]} {
    %c0 = arith.constant 0 : index
    %c0_0 = arith.constant 0 : index
    %c0_1 = arith.constant 0 : index
    %c0_2 = arith.constant 0 : index
    %0 = vector.load %arg1[%c0, %c0_0, %c0_1, %c0_2] : memref<1x4x8x8xbf16, #tpu.memory_space<vmem>>, vector<1x4x8x8xbf16>
    %1 = vector.shape_cast %0 : vector<1x4x8x8xbf16> to vector<4x8x8xbf16>
    %c0_3 = arith.constant 0 : index
    %c0_4 = arith.constant 0 : index
    %c0_5 = arith.constant 0 : index
    %c0_6 = arith.constant 0 : index
    %2 = vector.load %arg2[%c0_3, %c0_4, %c0_5, %c0_6] : memref<1x4x8x8xbf16, #tpu.memory_space<vmem>>, vector<1x4x8x8xbf16>
    %3 = vector.shape_cast %2 : vector<1x4x8x8xbf16> to vector<4x8x8xbf16>
    %c0_7 = arith.constant 0 : index
    %c0_8 = arith.constant 0 : index
    %c0_9 = arith.constant 0 : index
    %c0_10 = arith.constant 0 : index
    %4 = vector.load %arg3[%c0_7, %c0_8, %c0_9, %c0_10] : memref<1x4x8x8xbf16, #tpu.memory_space<vmem>>, vector<1x4x8x8xbf16>
    %5 = vector.shape_cast %4 : vector<1x4x8x8xbf16> to vector<4x8x8xbf16>
    "tpu.trace_start"() <{level = 10 : i32, message = "hqd,hkd->hqk"}> : () -> ()
    %cst = arith.constant dense<0.000000e+00> : vector<4x8x8xf32>
    %6 = tpu.matmul %1, %3, %cst {dimension_numbers = #tpu.dot_dimension_numbers<[2], [2], [1], [1], [0, 0, 0, 1, 1, 1], [0], [0]>} : vector<4x8x8xbf16>, vector<4x8x8xbf16>, vector<4x8x8xf32> -> vector<4x8x8xf32>
    "tpu.trace_stop"() : () -> ()
    %cst_11 = arith.constant 0.353553385 : f32
    %7 = vector.broadcast %cst_11 : f32 to vector<4x8x8xf32>
    %8 = arith.mulf %6, %7 : vector<4x8x8xf32>
    %c0_12 = arith.constant 0 : index
    %c0_13 = arith.constant 0 : index
    %c0_14 = arith.constant 0 : index
    %9 = vector.load %arg4[%c0_12, %c0_13, %c0_14] : memref<1x1x8xf32, #tpu.memory_space<vmem>>, vector<1x1x8xf32>
    %10 = vector.shape_cast %9 : vector<1x1x8xf32> to vector<1x8xf32>
    %11 = vector.shape_cast %10 : vector<1x8xf32> to vector<1x1x8xf32>
    %12 = vector.broadcast %11 : vector<1x1x8xf32> to vector<4x8x8xf32>
    %13 = arith.addf %8, %12 : vector<4x8x8xf32>
    %cst_15 = arith.constant dense<0xFF800000> : vector<4x8xf32>
    %14 = vector.multi_reduction <maximumf>, %13, %cst_15 [2] : vector<4x8x8xf32> to vector<4x8xf32>
    %15 = vector.shape_cast %14 : vector<4x8xf32> to vector<4x8x1xf32>
    %16 = vector.broadcast %15 : vector<4x8x1xf32> to vector<4x8x8xf32>
    %17 = arith.subf %13, %16 : vector<4x8x8xf32>
    %18 = math.exp %17 : vector<4x8x8xf32>
    %cst_16 = arith.constant dense<0.000000e+00> : vector<4x8xf32>
    %19 = vector.multi_reduction <add>, %18, %cst_16 [2] : vector<4x8x8xf32> to vector<4x8xf32>
    %20 = vector.shape_cast %19 : vector<4x8xf32> to vector<4x8x1xf32>
    %21 = tpu.reciprocal %20 {approx = true} : vector<4x8x1xf32> -> vector<4x8x1xf32>
    %22 = vector.broadcast %21 : vector<4x8x1xf32> to vector<4x8x8xf32>
    %23 = arith.mulf %18, %22 : vector<4x8x8xf32>
    %24 = arith.truncf %23 : vector<4x8x8xf32> to vector<4x8x8xbf16>
    "tpu.trace_start"() <{level = 10 : i32, message = "hqk,hkd->hqd"}> : () -> ()
    %cst_17 = arith.constant dense<0.000000e+00> : vector<4x8x8xf32>
    %25 = tpu.matmul %24, %5, %cst_17 {dimension_numbers = #tpu.dot_dimension_numbers<[2], [1], [1], [2], [0, 0, 0, 1, 1, 2], [0], [0]>} : vector<4x8x8xbf16>, vector<4x8x8xbf16>, vector<4x8x8xf32> -> vector<4x8x8xf32>
    "tpu.trace_stop"() : () -> ()
    %26 = arith.truncf %25 : vector<4x8x8xf32> to vector<4x8x8xbf16>
    %c0_18 = arith.constant 0 : index
    %c0_19 = arith.constant 0 : index
    %c0_20 = arith.constant 0 : index
    %c0_21 = arith.constant 0 : index
    %27 = vector.load %arg5[%c0_18, %c0_19, %c0_20, %c0_21] : memref<1x4x8x8xbf16, #tpu.memory_space<vmem>>, vector<1x4x8x8xbf16>
    %28 = vector.shape_cast %27 : vector<1x4x8x8xbf16> to vector<4x8x8xbf16>
    %29 = vector.shape_cast %26 : vector<4x8x8xbf16> to vector<1x4x8x8xbf16>
    tpu.vector_store %arg5[%c0_18, %c0_19, %c0_20, %c0_21], %29 {strides = array<i32>} : memref<1x4x8x8xbf16, #tpu.memory_space<vmem>>, vector<1x4x8x8xbf16>,
    return
  }
  func.func @transform_0(%arg0: i32) -> (i32, i32, i32, i32) {
    %c0_i32 = arith.constant 0 : i32
    %c0_i32_0 = arith.constant 0 : i32
    %c0_i32_1 = arith.constant 0 : i32
    %c0_i32_2 = arith.constant 0 : i32
    return %arg0, %c0_i32, %c0_i32_0, %c0_i32_1 : i32, i32, i32, i32
  }
  func.func @transform_1(%arg0: i32) -> (i32, i32, i32, i32) {
    %c0_i32 = arith.constant 0 : i32
    %c0_i32_0 = arith.constant 0 : i32
    %c0_i32_1 = arith.constant 0 : i32
    %c0_i32_2 = arith.constant 0 : i32
    return %arg0, %c0_i32, %c0_i32_0, %c0_i32_1 : i32, i32, i32, i32
  }
  func.func @transform_2(%arg0: i32) -> (i32, i32, i32, i32) {
    %c0_i32 = arith.constant 0 : i32
    %c0_i32_0 = arith.constant 0 : i32
    %c0_i32_1 = arith.constant 0 : i32
    %c0_i32_2 = arith.constant 0 : i32
    return %arg0, %c0_i32, %c0_i32_0, %c0_i32_1 : i32, i32, i32, i32
  }
  func.func @transform_3(%arg0: i32) -> (i32, i32, i32) {
    %c0_i32 = arith.constant 0 : i32
    %c0_i32_0 = arith.constant 0 : i32
    %c0_i32_1 = arith.constant 0 : i32
    return %arg0, %c0_i32, %c0_i32_0 : i32, i32, i32
  }
  func.func @transform_4(%arg0: i32) -> (i32, i32, i32, i32) {
    %c0_i32 = arith.constant 0 : i32
    %c0_i32_0 = arith.constant 0 : i32
    %c0_i32_1 = arith.constant 0 : i32
    %c0_i32_2 = arith.constant 0 : i32
    return %arg0, %c0_i32, %c0_i32_0, %c0_i32_1 : i32, i32, i32, i32
  }
}

module attributes {stable_mosaic.version = 11 : i64} {
  func.func @_matmul_kernel(%arg0: i32, %arg1: i32, %arg2: i32, %arg3: memref<16x32xbf16, #tpu.memory_space<vmem>>, %arg4: memref<32x32xbf16, #tpu.memory_space<vmem>>, %arg5: memref<1x32xf32, #tpu.memory_space<vmem>>, %arg6: memref<16x32xbf16, #tpu.memory_space<vmem>>, %arg7: memref<16x32xf32, #tpu.memory_space<vmem>>) attributes {dimension_semantics = [#tpu.dimension_semantics<parallel>, #tpu.dimension_semantics<parallel>, #tpu.dimension_semantics<arbitrary>], iteration_bounds = array<i64: 1, 1, 1>, scalar_prefetch = 0 : i64, scratch_operands = 1 : i64, tpu.core_type = #tpu.core_type<tc>, window_params = [{transform_indices = @transform_0, window_bounds = array<i64: 16, 32>}, {transform_indices = @transform_1, window_bounds = array<i64: 32, 32>}, {transform_indices = @transform_2, window_bounds = array<i64: 1, 32>}, {transform_indices = @transform_3, window_bounds = array<i64: 16, 32>}]} {
    %c0_i32 = arith.constant 0 : i32
    %0 = arith.cmpi eq, %arg2, %c0_i32 : i32
    %1 = arith.extui %0 : i1 to i32
    %c0_i32_0 = arith.constant 0 : i32
    %2 = arith.cmpi ne, %1, %c0_i32_0 : i32
    scf.if %2 {
      %cst_10 = arith.constant 0.000000e+00 : f32
      %12 = vector.broadcast %cst_10 : f32 to vector<16x32xf32>
      %c0_11 = arith.constant 0 : index
      %c0_12 = arith.constant 0 : index
      %13 = vector.load %arg7[%c0_11, %c0_12] : memref<16x32xf32, #tpu.memory_space<vmem>>, vector<16x32xf32>
      tpu.vector_store %arg7[%c0_11, %c0_12], %12 {strides = array<i32>} : memref<16x32xf32, #tpu.memory_space<vmem>>, vector<16x32xf32>,
    } else {
    }
    %c0 = arith.constant 0 : index
    %c0_1 = arith.constant 0 : index
    %3 = vector.load %arg7[%c0, %c0_1] : memref<16x32xf32, #tpu.memory_space<vmem>>, vector<16x32xf32>
    %c0_2 = arith.constant 0 : index
    %c0_3 = arith.constant 0 : index
    %4 = vector.load %arg3[%c0_2, %c0_3] : memref<16x32xbf16, #tpu.memory_space<vmem>>, vector<16x32xbf16>
    %c0_4 = arith.constant 0 : index
    %c0_5 = arith.constant 0 : index
    %5 = vector.load %arg4[%c0_4, %c0_5] : memref<32x32xbf16, #tpu.memory_space<vmem>>, vector<32x32xbf16>
    %cst = arith.constant dense<0.000000e+00> : vector<16x32xf32>
    %6 = tpu.matmul %4, %5, %cst {dimension_numbers = #tpu.dot_dimension_numbers<[1], [0], [0], [1], [0, 0, 1, 1], [], []>} : vector<16x32xbf16>, vector<32x32xbf16>, vector<16x32xf32> -> vector<16x32xf32>
    %7 = arith.addf %3, %6 : vector<16x32xf32>
    %c0_6 = arith.constant 0 : index
    %c0_7 = arith.constant 0 : index
    %8 = vector.load %arg7[%c0_6, %c0_7] : memref<16x32xf32, #tpu.memory_space<vmem>>, vector<16x32xf32>
    tpu.vector_store %arg7[%c0_6, %c0_7], %7 {strides = array<i32>} : memref<16x32xf32, #tpu.memory_space<vmem>>, vector<16x32xf32>,
    %c0_i32_8 = arith.constant 0 : i32
    %9 = arith.cmpi eq, %arg2, %c0_i32_8 : i32
    %10 = arith.extui %9 : i1 to i32
    %c0_i32_9 = arith.constant 0 : i32
    %11 = arith.cmpi ne, %10, %c0_i32_9 : i32
    scf.if %11 {
      %c0_10 = arith.constant 0 : index
      %c0_11 = arith.constant 0 : index
      %12 = vector.load %arg7[%c0_10, %c0_11] : memref<16x32xf32, #tpu.memory_space<vmem>>, vector<16x32xf32>
      %c0_12 = arith.constant 0 : index
      %c0_13 = arith.constant 0 : index
      %13 = vector.load %arg5[%c0_12, %c0_13] : memref<1x32xf32, #tpu.memory_space<vmem>>, vector<1x32xf32>
      %14 = vector.broadcast %13 : vector<1x32xf32> to vector<16x32xf32>
      %15 = arith.addf %12, %14 : vector<16x32xf32>
      %16 = arith.truncf %15 : vector<16x32xf32> to vector<16x32xbf16>
      %c0_14 = arith.constant 0 : index
      %c0_15 = arith.constant 0 : index
      %17 = vector.load %arg6[%c0_14, %c0_15] : memref<16x32xbf16, #tpu.memory_space<vmem>>, vector<16x32xbf16>
      tpu.vector_store %arg6[%c0_14, %c0_15], %16 {strides = array<i32>} : memref<16x32xbf16, #tpu.memory_space<vmem>>, vector<16x32xbf16>,
    } else {
    }
    return
  }
  func.func @transform_0(%arg0: i32, %arg1: i32, %arg2: i32) -> (i32, i32) {
    %c0_i32 = arith.constant 0 : i32
    return %arg0, %arg2 : i32, i32
  }
  func.func @transform_1(%arg0: i32, %arg1: i32, %arg2: i32) -> (i32, i32) {
    %c0_i32 = arith.constant 0 : i32
    return %arg2, %arg1 : i32, i32
  }
  func.func @transform_2(%arg0: i32, %arg1: i32, %arg2: i32) -> (i32, i32) {
    %c0_i32 = arith.constant 0 : i32
    %c0_i32_0 = arith.constant 0 : i32
    return %c0_i32, %arg1 : i32, i32
  }
  func.func @transform_3(%arg0: i32, %arg1: i32, %arg2: i32) -> (i32, i32) {
    %c0_i32 = arith.constant 0 : i32
    return %arg0, %arg1 : i32, i32
  }
}

module attributes {stable_mosaic.version = 11 : i64} {
  func.func @_add_ln_kernel(%arg0: i32, %arg1: memref<16x32xbf16, #tpu.memory_space<vmem>>, %arg2: memref<16x32xbf16, #tpu.memory_space<vmem>>, %arg3: memref<1x32xf32, #tpu.memory_space<vmem>>, %arg4: memref<1x32xf32, #tpu.memory_space<vmem>>, %arg5: memref<16x32xbf16, #tpu.memory_space<vmem>>) attributes {dimension_semantics = [#tpu.dimension_semantics<parallel>], iteration_bounds = array<i64: 1>, scalar_prefetch = 0 : i64, scratch_operands = 0 : i64, tpu.core_type = #tpu.core_type<tc>, window_params = [{transform_indices = @transform_0, window_bounds = array<i64: 16, 32>}, {transform_indices = @transform_1, window_bounds = array<i64: 16, 32>}, {pipeline_mode = #tpu.pipeline_mode<synchronous>, transform_indices = @transform_2, window_bounds = array<i64: 1, 32>}, {pipeline_mode = #tpu.pipeline_mode<synchronous>, transform_indices = @transform_3, window_bounds = array<i64: 1, 32>}, {transform_indices = @transform_4, window_bounds = array<i64: 16, 32>}]} {
    %c0 = arith.constant 0 : index
    %c0_0 = arith.constant 0 : index
    %0 = vector.load %arg1[%c0, %c0_0] : memref<16x32xbf16, #tpu.memory_space<vmem>>, vector<16x32xbf16>
    %1 = arith.extf %0 : vector<16x32xbf16> to vector<16x32xf32>
    %c0_1 = arith.constant 0 : index
    %c0_2 = arith.constant 0 : index
    %2 = vector.load %arg2[%c0_1, %c0_2] : memref<16x32xbf16, #tpu.memory_space<vmem>>, vector<16x32xbf16>
    %3 = arith.extf %2 : vector<16x32xbf16> to vector<16x32xf32>
    %4 = arith.addf %1, %3 : vector<16x32xf32>
    %cst = arith.constant dense<0.000000e+00> : vector<16xf32>
    %5 = vector.multi_reduction <add>, %4, %cst [1] : vector<16x32xf32> to vector<16xf32>
    %6 = vector.shape_cast %5 : vector<16xf32> to vector<16x1xf32>
    %cst_3 = arith.constant 3.200000e+01 : f32
    %7 = vector.broadcast %cst_3 : f32 to vector<16x1xf32>
    %8 = arith.divf %6, %7 : vector<16x1xf32>
    %9 = vector.broadcast %8 : vector<16x1xf32> to vector<16x32xf32>
    %10 = arith.subf %4, %9 : vector<16x32xf32>
    %11 = arith.mulf %10, %10 : vector<16x32xf32>
    %cst_4 = arith.constant dense<0.000000e+00> : vector<16xf32>
    %12 = vector.multi_reduction <add>, %11, %cst_4 [1] : vector<16x32xf32> to vector<16xf32>
    %13 = vector.shape_cast %12 : vector<16xf32> to vector<16x1xf32>
    %cst_5 = arith.constant 3.200000e+01 : f32
    %14 = vector.broadcast %cst_5 : f32 to vector<16x1xf32>
    %15 = arith.divf %13, %14 : vector<16x1xf32>
    %16 = vector.broadcast %8 : vector<16x1xf32> to vector<16x32xf32>
    %17 = arith.subf %4, %16 : vector<16x32xf32>
    %cst_6 = arith.constant 9.99999996E-13 : f32
    %18 = vector.broadcast %cst_6 : f32 to vector<16x1xf32>
    %19 = arith.addf %15, %18 : vector<16x1xf32>
    %20 = math.rsqrt %19 : vector<16x1xf32>
    %21 = vector.broadcast %20 : vector<16x1xf32> to vector<16x32xf32>
    %22 = arith.mulf %17, %21 : vector<16x32xf32>
    %c0_7 = arith.constant 0 : index
    %c0_8 = arith.constant 0 : index
    %23 = vector.load %arg3[%c0_7, %c0_8] : memref<1x32xf32, #tpu.memory_space<vmem>>, vector<1x32xf32>
    %24 = vector.broadcast %23 : vector<1x32xf32> to vector<16x32xf32>
    %25 = arith.mulf %22, %24 : vector<16x32xf32>
    %c0_9 = arith.constant 0 : index
    %c0_10 = arith.constant 0 : index
    %26 = vector.load %arg4[%c0_9, %c0_10] : memref<1x32xf32, #tpu.memory_space<vmem>>, vector<1x32xf32>
    %27 = vector.broadcast %26 : vector<1x32xf32> to vector<16x32xf32>
    %28 = arith.addf %25, %27 : vector<16x32xf32>
    %29 = arith.truncf %28 : vector<16x32xf32> to vector<16x32xbf16>
    %c0_11 = arith.constant 0 : index
    %c0_12 = arith.constant 0 : index
    %30 = vector.load %arg5[%c0_11, %c0_12] : memref<16x32xbf16, #tpu.memory_space<vmem>>, vector<16x32xbf16>
    tpu.vector_store %arg5[%c0_11, %c0_12], %29 {strides = array<i32>} : memref<16x32xbf16, #tpu.memory_space<vmem>>, vector<16x32xbf16>,
    return
  }
  func.func @transform_0(%arg0: i32) -> (i32, i32) {
    %c0_i32 = arith.constant 0 : i32
    %c0_i32_0 = arith.constant 0 : i32
    return %arg0, %c0_i32 : i32, i32
  }
  func.func @transform_1(%arg0: i32) -> (i32, i32) {
    %c0_i32 = arith.constant 0 : i32
    %c0_i32_0 = arith.constant 0 : i32
    return %arg0, %c0_i32 : i32, i32
  }
  func.func @transform_2(%arg0: i32) -> (i32, i32) {
    %c0_i32 = arith.constant 0 : i32
    %c0_i32_0 = arith.constant 0 : i32
    %c0_i32_1 = arith.constant 0 : i32
    return %c0_i32, %c0_i32_0 : i32, i32
  }
  func.func @transform_3(%arg0: i32) -> (i32, i32) {
    %c0_i32 = arith.constant 0 : i32
    %c0_i32_0 = arith.constant 0 : i32
    %c0_i32_1 = arith.constant 0 : i32
    return %c0_i32, %c0_i32_0 : i32, i32
  }
  func.func @transform_4(%arg0: i32) -> (i32, i32) {
    %c0_i32 = arith.constant 0 : i32
    %c0_i32_0 = arith.constant 0 : i32
    return %arg0, %c0_i32 : i32, i32
  }
}

module attributes {stable_mosaic.version = 11 : i64} {
  func.func @_matmul_kernel(%arg0: i32, %arg1: i32, %arg2: i32, %arg3: memref<16x32xbf16, #tpu.memory_space<vmem>>, %arg4: memref<32x64xbf16, #tpu.memory_space<vmem>>, %arg5: memref<1x64xf32, #tpu.memory_space<vmem>>, %arg6: memref<16x64xbf16, #tpu.memory_space<vmem>>, %arg7: memref<16x64xf32, #tpu.memory_space<vmem>>) attributes {dimension_semantics = [#tpu.dimension_semantics<parallel>, #tpu.dimension_semantics<parallel>, #tpu.dimension_semantics<arbitrary>], iteration_bounds = array<i64: 1, 1, 1>, scalar_prefetch = 0 : i64, scratch_operands = 1 : i64, tpu.core_type = #tpu.core_type<tc>, window_params = [{transform_indices = @transform_0, window_bounds = array<i64: 16, 32>}, {transform_indices = @transform_1, window_bounds = array<i64: 32, 64>}, {transform_indices = @transform_2, window_bounds = array<i64: 1, 64>}, {transform_indices = @transform_3, window_bounds = array<i64: 16, 64>}]} {
    %c0_i32 = arith.constant 0 : i32
    %0 = arith.cmpi eq, %arg2, %c0_i32 : i32
    %1 = arith.extui %0 : i1 to i32
    %c0_i32_0 = arith.constant 0 : i32
    %2 = arith.cmpi ne, %1, %c0_i32_0 : i32
    scf.if %2 {
      %cst_10 = arith.constant 0.000000e+00 : f32
      %12 = vector.broadcast %cst_10 : f32 to vector<16x64xf32>
      %c0_11 = arith.constant 0 : index
      %c0_12 = arith.constant 0 : index
      %13 = vector.load %arg7[%c0_11, %c0_12] : memref<16x64xf32, #tpu.memory_space<vmem>>, vector<16x64xf32>
      tpu.vector_store %arg7[%c0_11, %c0_12], %12 {strides = array<i32>} : memref<16x64xf32, #tpu.memory_space<vmem>>, vector<16x64xf32>,
    } else {
    }
    %c0 = arith.constant 0 : index
    %c0_1 = arith.constant 0 : index
    %3 = vector.load %arg7[%c0, %c0_1] : memref<16x64xf32, #tpu.memory_space<vmem>>, vector<16x64xf32>
    %c0_2 = arith.constant 0 : index
    %c0_3 = arith.constant 0 : index
    %4 = vector.load %arg3[%c0_2, %c0_3] : memref<16x32xbf16, #tpu.memory_space<vmem>>, vector<16x32xbf16>
    %c0_4 = arith.constant 0 : index
    %c0_5 = arith.constant 0 : index
    %5 = vector.load %arg4[%c0_4, %c0_5] : memref<32x64xbf16, #tpu.memory_space<vmem>>, vector<32x64xbf16>
    %cst = arith.constant dense<0.000000e+00> : vector<16x64xf32>
    %6 = tpu.matmul %4, %5, %cst {dimension_numbers = #tpu.dot_dimension_numbers<[1], [0], [0], [1], [0, 0, 1, 1], [], []>} : vector<16x32xbf16>, vector<32x64xbf16>, vector<16x64xf32> -> vector<16x64xf32>
    %7 = arith.addf %3, %6 : vector<16x64xf32>
    %c0_6 = arith.constant 0 : index
    %c0_7 = arith.constant 0 : index
    %8 = vector.load %arg7[%c0_6, %c0_7] : memref<16x64xf32, #tpu.memory_space<vmem>>, vector<16x64xf32>
    tpu.vector_store %arg7[%c0_6, %c0_7], %7 {strides = array<i32>} : memref<16x64xf32, #tpu.memory_space<vmem>>, vector<16x64xf32>,
    %c0_i32_8 = arith.constant 0 : i32
    %9 = arith.cmpi eq, %arg2, %c0_i32_8 : i32
    %10 = arith.extui %9 : i1 to i32
    %c0_i32_9 = arith.constant 0 : i32
    %11 = arith.cmpi ne, %10, %c0_i32_9 : i32
    scf.if %11 {
      %c0_10 = arith.constant 0 : index
      %c0_11 = arith.constant 0 : index
      %12 = vector.load %arg7[%c0_10, %c0_11] : memref<16x64xf32, #tpu.memory_space<vmem>>, vector<16x64xf32>
      %c0_12 = arith.constant 0 : index
      %c0_13 = arith.constant 0 : index
      %13 = vector.load %arg5[%c0_12, %c0_13] : memref<1x64xf32, #tpu.memory_space<vmem>>, vector<1x64xf32>
      %14 = vector.broadcast %13 : vector<1x64xf32> to vector<16x64xf32>
      %15 = arith.addf %12, %14 : vector<16x64xf32>
      %16 = arith.mulf %15, %15 : vector<16x64xf32>
      %17 = arith.mulf %15, %16 : vector<16x64xf32>
      %cst_14 = arith.constant 4.471500e-02 : f32
      %18 = vector.broadcast %cst_14 : f32 to vector<16x64xf32>
      %19 = arith.mulf %18, %17 : vector<16x64xf32>
      %20 = arith.addf %15, %19 : vector<16x64xf32>
      %cst_15 = arith.constant 0.797884583 : f32
      %21 = vector.broadcast %cst_15 : f32 to vector<16x64xf32>
      %22 = arith.mulf %21, %20 : vector<16x64xf32>
      %23 = math.tanh %22 : vector<16x64xf32>
      %cst_16 = arith.constant 1.000000e+00 : f32
      %24 = vector.broadcast %cst_16 : f32 to vector<16x64xf32>
      %25 = arith.addf %24, %23 : vector<16x64xf32>
      %cst_17 = arith.constant 5.000000e-01 : f32
      %26 = vector.broadcast %cst_17 : f32 to vector<16x64xf32>
      %27 = arith.mulf %26, %25 : vector<16x64xf32>
      %28 = arith.mulf %15, %27 : vector<16x64xf32>
      %29 = arith.truncf %28 : vector<16x64xf32> to vector<16x64xbf16>
      %c0_18 = arith.constant 0 : index
      %c0_19 = arith.constant 0 : index
      %30 = vector.load %arg6[%c0_18, %c0_19] : memref<16x64xbf16, #tpu.memory_space<vmem>>, vector<16x64xbf16>
      tpu.vector_store %arg6[%c0_18, %c0_19], %29 {strides = array<i32>} : memref<16x64xbf16, #tpu.memory_space<vmem>>, vector<16x64xbf16>,
    } else {
    }
    return
  }
  func.func @transform_0(%arg0: i32, %arg1: i32, %arg2: i32) -> (i32, i32) {
    %c0_i32 = arith.constant 0 : i32
    return %arg0, %arg2 : i32, i32
  }
  func.func @transform_1(%arg0: i32, %arg1: i32, %arg2: i32) -> (i32, i32) {
    %c0_i32 = arith.constant 0 : i32
    return %arg2, %arg1 : i32, i32
  }
  func.func @transform_2(%arg0: i32, %arg1: i32, %arg2: i32) -> (i32, i32) {
    %c0_i32 = arith.constant 0 : i32
    %c0_i32_0 = arith.constant 0 : i32
    return %c0_i32, %arg1 : i32, i32
  }
  func.func @transform_3(%arg0: i32, %arg1: i32, %arg2: i32) -> (i32, i32) {
    %c0_i32 = arith.constant 0 : i32
    return %arg0, %arg1 : i32, i32
  }
}

module attributes {stable_mosaic.version = 11 : i64} {
  func.func @_matmul_kernel(%arg0: i32, %arg1: i32, %arg2: i32, %arg3: memref<16x64xbf16, #tpu.memory_space<vmem>>, %arg4: memref<64x32xbf16, #tpu.memory_space<vmem>>, %arg5: memref<1x32xf32, #tpu.memory_space<vmem>>, %arg6: memref<16x32xbf16, #tpu.memory_space<vmem>>, %arg7: memref<16x32xf32, #tpu.memory_space<vmem>>) attributes {dimension_semantics = [#tpu.dimension_semantics<parallel>, #tpu.dimension_semantics<parallel>, #tpu.dimension_semantics<arbitrary>], iteration_bounds = array<i64: 1, 1, 1>, scalar_prefetch = 0 : i64, scratch_operands = 1 : i64, tpu.core_type = #tpu.core_type<tc>, window_params = [{transform_indices = @transform_0, window_bounds = array<i64: 16, 64>}, {transform_indices = @transform_1, window_bounds = array<i64: 64, 32>}, {transform_indices = @transform_2, window_bounds = array<i64: 1, 32>}, {transform_indices = @transform_3, window_bounds = array<i64: 16, 32>}]} {
    %c0_i32 = arith.constant 0 : i32
    %0 = arith.cmpi eq, %arg2, %c0_i32 : i32
    %1 = arith.extui %0 : i1 to i32
    %c0_i32_0 = arith.constant 0 : i32
    %2 = arith.cmpi ne, %1, %c0_i32_0 : i32
    scf.if %2 {
      %cst_10 = arith.constant 0.000000e+00 : f32
      %12 = vector.broadcast %cst_10 : f32 to vector<16x32xf32>
      %c0_11 = arith.constant 0 : index
      %c0_12 = arith.constant 0 : index
      %13 = vector.load %arg7[%c0_11, %c0_12] : memref<16x32xf32, #tpu.memory_space<vmem>>, vector<16x32xf32>
      tpu.vector_store %arg7[%c0_11, %c0_12], %12 {strides = array<i32>} : memref<16x32xf32, #tpu.memory_space<vmem>>, vector<16x32xf32>,
    } else {
    }
    %c0 = arith.constant 0 : index
    %c0_1 = arith.constant 0 : index
    %3 = vector.load %arg7[%c0, %c0_1] : memref<16x32xf32, #tpu.memory_space<vmem>>, vector<16x32xf32>
    %c0_2 = arith.constant 0 : index
    %c0_3 = arith.constant 0 : index
    %4 = vector.load %arg3[%c0_2, %c0_3] : memref<16x64xbf16, #tpu.memory_space<vmem>>, vector<16x64xbf16>
    %c0_4 = arith.constant 0 : index
    %c0_5 = arith.constant 0 : index
    %5 = vector.load %arg4[%c0_4, %c0_5] : memref<64x32xbf16, #tpu.memory_space<vmem>>, vector<64x32xbf16>
    %cst = arith.constant dense<0.000000e+00> : vector<16x32xf32>
    %6 = tpu.matmul %4, %5, %cst {dimension_numbers = #tpu.dot_dimension_numbers<[1], [0], [0], [1], [0, 0, 1, 1], [], []>} : vector<16x64xbf16>, vector<64x32xbf16>, vector<16x32xf32> -> vector<16x32xf32>
    %7 = arith.addf %3, %6 : vector<16x32xf32>
    %c0_6 = arith.constant 0 : index
    %c0_7 = arith.constant 0 : index
    %8 = vector.load %arg7[%c0_6, %c0_7] : memref<16x32xf32, #tpu.memory_space<vmem>>, vector<16x32xf32>
    tpu.vector_store %arg7[%c0_6, %c0_7], %7 {strides = array<i32>} : memref<16x32xf32, #tpu.memory_space<vmem>>, vector<16x32xf32>,
    %c0_i32_8 = arith.constant 0 : i32
    %9 = arith.cmpi eq, %arg2, %c0_i32_8 : i32
    %10 = arith.extui %9 : i1 to i32
    %c0_i32_9 = arith.constant 0 : i32
    %11 = arith.cmpi ne, %10, %c0_i32_9 : i32
    scf.if %11 {
      %c0_10 = arith.constant 0 : index
      %c0_11 = arith.constant 0 : index
      %12 = vector.load %arg7[%c0_10, %c0_11] : memref<16x32xf32, #tpu.memory_space<vmem>>, vector<16x32xf32>
      %c0_12 = arith.constant 0 : index
      %c0_13 = arith.constant 0 : index
      %13 = vector.load %arg5[%c0_12, %c0_13] : memref<1x32xf32, #tpu.memory_space<vmem>>, vector<1x32xf32>
      %14 = vector.broadcast %13 : vector<1x32xf32> to vector<16x32xf32>
      %15 = arith.addf %12, %14 : vector<16x32xf32>
      %16 = arith.truncf %15 : vector<16x32xf32> to vector<16x32xbf16>
      %c0_14 = arith.constant 0 : index
      %c0_15 = arith.constant 0 : index
      %17 = vector.load %arg6[%c0_14, %c0_15] : memref<16x32xbf16, #tpu.memory_space<vmem>>, vector<16x32xbf16>
      tpu.vector_store %arg6[%c0_14, %c0_15], %16 {strides = array<i32>} : memref<16x32xbf16, #tpu.memory_space<vmem>>, vector<16x32xbf16>,
    } else {
    }
    return
  }
  func.func @transform_0(%arg0: i32, %arg1: i32, %arg2: i32) -> (i32, i32) {
    %c0_i32 = arith.constant 0 : i32
    return %arg0, %arg2 : i32, i32
  }
  func.func @transform_1(%arg0: i32, %arg1: i32, %arg2: i32) -> (i32, i32) {
    %c0_i32 = arith.constant 0 : i32
    return %arg2, %arg1 : i32, i32
  }
  func.func @transform_2(%arg0: i32, %arg1: i32, %arg2: i32) -> (i32, i32) {
    %c0_i32 = arith.constant 0 : i32
    %c0_i32_0 = arith.constant 0 : i32
    return %c0_i32, %arg1 : i32, i32
  }
  func.func @transform_3(%arg0: i32, %arg1: i32, %arg2: i32) -> (i32, i32) {
    %c0_i32 = arith.constant 0 : i32
    return %arg0, %arg1 : i32, i32
  }
}

module attributes {stable_mosaic.version = 11 : i64} {
  func.func @_matmul_kernel(%arg0: i32, %arg1: i32, %arg2: i32, %arg3: memref<2x32xbf16, #tpu.memory_space<vmem>>, %arg4: memref<32x4xbf16, #tpu.memory_space<vmem>>, %arg5: memref<1x4xf32, #tpu.memory_space<vmem>>, %arg6: memref<2x4xf32, #tpu.memory_space<vmem>>, %arg7: memref<2x4xf32, #tpu.memory_space<vmem>>) attributes {dimension_semantics = [#tpu.dimension_semantics<parallel>, #tpu.dimension_semantics<parallel>, #tpu.dimension_semantics<arbitrary>], iteration_bounds = array<i64: 1, 1, 1>, scalar_prefetch = 0 : i64, scratch_operands = 1 : i64, tpu.core_type = #tpu.core_type<tc>, window_params = [{transform_indices = @transform_0, window_bounds = array<i64: 2, 32>}, {transform_indices = @transform_1, window_bounds = array<i64: 32, 4>}, {transform_indices = @transform_2, window_bounds = array<i64: 1, 4>}, {transform_indices = @transform_3, window_bounds = array<i64: 2, 4>}]} {
    %c0_i32 = arith.constant 0 : i32
    %0 = arith.cmpi eq, %arg2, %c0_i32 : i32
    %1 = arith.extui %0 : i1 to i32
    %c0_i32_0 = arith.constant 0 : i32
    %2 = arith.cmpi ne, %1, %c0_i32_0 : i32
    scf.if %2 {
      %cst_10 = arith.constant 0.000000e+00 : f32
      %12 = vector.broadcast %cst_10 : f32 to vector<2x4xf32>
      %c0_11 = arith.constant 0 : index
      %c0_12 = arith.constant 0 : index
      %13 = vector.load %arg7[%c0_11, %c0_12] : memref<2x4xf32, #tpu.memory_space<vmem>>, vector<2x4xf32>
      tpu.vector_store %arg7[%c0_11, %c0_12], %12 {strides = array<i32>} : memref<2x4xf32, #tpu.memory_space<vmem>>, vector<2x4xf32>,
    } else {
    }
    %c0 = arith.constant 0 : index
    %c0_1 = arith.constant 0 : index
    %3 = vector.load %arg7[%c0, %c0_1] : memref<2x4xf32, #tpu.memory_space<vmem>>, vector<2x4xf32>
    %c0_2 = arith.constant 0 : index
    %c0_3 = arith.constant 0 : index
    %4 = vector.load %arg3[%c0_2, %c0_3] : memref<2x32xbf16, #tpu.memory_space<vmem>>, vector<2x32xbf16>
    %c0_4 = arith.constant 0 : index
    %c0_5 = arith.constant 0 : index
    %5 = vector.load %arg4[%c0_4, %c0_5] : memref<32x4xbf16, #tpu.memory_space<vmem>>, vector<32x4xbf16>
    %cst = arith.constant dense<0.000000e+00> : vector<2x4xf32>
    %6 = tpu.matmul %4, %5, %cst {dimension_numbers = #tpu.dot_dimension_numbers<[1], [0], [0], [1], [0, 0, 1, 1], [], []>} : vector<2x32xbf16>, vector<32x4xbf16>, vector<2x4xf32> -> vector<2x4xf32>
    %7 = arith.addf %3, %6 : vector<2x4xf32>
    %c0_6 = arith.constant 0 : index
    %c0_7 = arith.constant 0 : index
    %8 = vector.load %arg7[%c0_6, %c0_7] : memref<2x4xf32, #tpu.memory_space<vmem>>, vector<2x4xf32>
    tpu.vector_store %arg7[%c0_6, %c0_7], %7 {strides = array<i32>} : memref<2x4xf32, #tpu.memory_space<vmem>>, vector<2x4xf32>,
    %c0_i32_8 = arith.constant 0 : i32
    %9 = arith.cmpi eq, %arg2, %c0_i32_8 : i32
    %10 = arith.extui %9 : i1 to i32
    %c0_i32_9 = arith.constant 0 : i32
    %11 = arith.cmpi ne, %10, %c0_i32_9 : i32
    scf.if %11 {
      %c0_10 = arith.constant 0 : index
      %c0_11 = arith.constant 0 : index
      %12 = vector.load %arg7[%c0_10, %c0_11] : memref<2x4xf32, #tpu.memory_space<vmem>>, vector<2x4xf32>
      %c0_12 = arith.constant 0 : index
      %c0_13 = arith.constant 0 : index
      %13 = vector.load %arg5[%c0_12, %c0_13] : memref<1x4xf32, #tpu.memory_space<vmem>>, vector<1x4xf32>
      %14 = vector.broadcast %13 : vector<1x4xf32> to vector<2x4xf32>
      %15 = arith.addf %12, %14 : vector<2x4xf32>
      %c0_14 = arith.constant 0 : index
      %c0_15 = arith.constant 0 : index
      %16 = vector.load %arg6[%c0_14, %c0_15] : memref<2x4xf32, #tpu.memory_space<vmem>>, vector<2x4xf32>
      tpu.vector_store %arg6[%c0_14, %c0_15], %15 {strides = array<i32>} : memref<2x4xf32, #tpu.memory_space<vmem>>, vector<2x4xf32>,
    } else {
    }
    return
  }
  func.func @transform_0(%arg0: i32, %arg1: i32, %arg2: i32) -> (i32, i32) {
    %c0_i32 = arith.constant 0 : i32
    return %arg0, %arg2 : i32, i32
  }
  func.func @transform_1(%arg0: i32, %arg1: i32, %arg2: i32) -> (i32, i32) {
    %c0_i32 = arith.constant 0 : i32
    return %arg2, %arg1 : i32, i32
  }
  func.func @transform_2(%arg0: i32, %arg1: i32, %arg2: i32) -> (i32, i32) {
    %c0_i32 = arith.constant 0 : i32
    %c0_i32_0 = arith.constant 0 : i32
    return %c0_i32, %arg1 : i32, i32
  }
  func.func @transform_3(%arg0: i32, %arg1: i32, %arg2: i32) -> (i32, i32) {
    %c0_i32 = arith.constant 0 : i32
    return %arg0, %arg1 : i32, i32
  }
}

module attributes {stable_mosaic.version = 11 : i64} {
  func.func @_matmul_kernel(%arg0: i32, %arg1: i32, %arg2: i32, %arg3: memref<2x32xbf16, #tpu.memory_space<vmem>>, %arg4: memref<32x32xbf16, #tpu.memory_space<vmem>>, %arg5: memref<1x32xf32, #tpu.memory_space<vmem>>, %arg6: memref<2x32xbf16, #tpu.memory_space<vmem>>, %arg7: memref<2x32xf32, #tpu.memory_space<vmem>>) attributes {dimension_semantics = [#tpu.dimension_semantics<parallel>, #tpu.dimension_semantics<parallel>, #tpu.dimension_semantics<arbitrary>], iteration_bounds = array<i64: 1, 1, 1>, scalar_prefetch = 0 : i64, scratch_operands = 1 : i64, tpu.core_type = #tpu.core_type<tc>, window_params = [{transform_indices = @transform_0, window_bounds = array<i64: 2, 32>}, {transform_indices = @transform_1, window_bounds = array<i64: 32, 32>}, {transform_indices = @transform_2, window_bounds = array<i64: 1, 32>}, {transform_indices = @transform_3, window_bounds = array<i64: 2, 32>}]} {
    %c0_i32 = arith.constant 0 : i32
    %0 = arith.cmpi eq, %arg2, %c0_i32 : i32
    %1 = arith.extui %0 : i1 to i32
    %c0_i32_0 = arith.constant 0 : i32
    %2 = arith.cmpi ne, %1, %c0_i32_0 : i32
    scf.if %2 {
      %cst_10 = arith.constant 0.000000e+00 : f32
      %12 = vector.broadcast %cst_10 : f32 to vector<2x32xf32>
      %c0_11 = arith.constant 0 : index
      %c0_12 = arith.constant 0 : index
      %13 = vector.load %arg7[%c0_11, %c0_12] : memref<2x32xf32, #tpu.memory_space<vmem>>, vector<2x32xf32>
      tpu.vector_store %arg7[%c0_11, %c0_12], %12 {strides = array<i32>} : memref<2x32xf32, #tpu.memory_space<vmem>>, vector<2x32xf32>,
    } else {
    }
    %c0 = arith.constant 0 : index
    %c0_1 = arith.constant 0 : index
    %3 = vector.load %arg7[%c0, %c0_1] : memref<2x32xf32, #tpu.memory_space<vmem>>, vector<2x32xf32>
    %c0_2 = arith.constant 0 : index
    %c0_3 = arith.constant 0 : index
    %4 = vector.load %arg3[%c0_2, %c0_3] : memref<2x32xbf16, #tpu.memory_space<vmem>>, vector<2x32xbf16>
    %c0_4 = arith.constant 0 : index
    %c0_5 = arith.constant 0 : index
    %5 = vector.load %arg4[%c0_4, %c0_5] : memref<32x32xbf16, #tpu.memory_space<vmem>>, vector<32x32xbf16>
    %cst = arith.constant dense<0.000000e+00> : vector<2x32xf32>
    %6 = tpu.matmul %4, %5, %cst {dimension_numbers = #tpu.dot_dimension_numbers<[1], [0], [0], [1], [0, 0, 1, 1], [], []>} : vector<2x32xbf16>, vector<32x32xbf16>, vector<2x32xf32> -> vector<2x32xf32>
    %7 = arith.addf %3, %6 : vector<2x32xf32>
    %c0_6 = arith.constant 0 : index
    %c0_7 = arith.constant 0 : index
    %8 = vector.load %arg7[%c0_6, %c0_7] : memref<2x32xf32, #tpu.memory_space<vmem>>, vector<2x32xf32>
    tpu.vector_store %arg7[%c0_6, %c0_7], %7 {strides = array<i32>} : memref<2x32xf32, #tpu.memory_space<vmem>>, vector<2x32xf32>,
    %c0_i32_8 = arith.constant 0 : i32
    %9 = arith.cmpi eq, %arg2, %c0_i32_8 : i32
    %10 = arith.extui %9 : i1 to i32
    %c0_i32_9 = arith.constant 0 : i32
    %11 = arith.cmpi ne, %10, %c0_i32_9 : i32
    scf.if %11 {
      %c0_10 = arith.constant 0 : index
      %c0_11 = arith.constant 0 : index
      %12 = vector.load %arg7[%c0_10, %c0_11] : memref<2x32xf32, #tpu.memory_space<vmem>>, vector<2x32xf32>
      %c0_12 = arith.constant 0 : index
      %c0_13 = arith.constant 0 : index
      %13 = vector.load %arg5[%c0_12, %c0_13] : memref<1x32xf32, #tpu.memory_space<vmem>>, vector<1x32xf32>
      %14 = vector.broadcast %13 : vector<1x32xf32> to vector<2x32xf32>
      %15 = arith.addf %12, %14 : vector<2x32xf32>
      %16 = math.tanh %15 : vector<2x32xf32>
      %17 = arith.truncf %16 : vector<2x32xf32> to vector<2x32xbf16>
      %c0_14 = arith.constant 0 : index
      %c0_15 = arith.constant 0 : index
      %18 = vector.load %arg6[%c0_14, %c0_15] : memref<2x32xbf16, #tpu.memory_space<vmem>>, vector<2x32xbf16>
      tpu.vector_store %arg6[%c0_14, %c0_15], %17 {strides = array<i32>} : memref<2x32xbf16, #tpu.memory_space<vmem>>, vector<2x32xbf16>,
    } else {
    }
    return
  }
  func.func @transform_0(%arg0: i32, %arg1: i32, %arg2: i32) -> (i32, i32) {
    %c0_i32 = arith.constant 0 : i32
    return %arg0, %arg2 : i32, i32
  }
  func.func @transform_1(%arg0: i32, %arg1: i32, %arg2: i32) -> (i32, i32) {
    %c0_i32 = arith.constant 0 : i32
    return %arg2, %arg1 : i32, i32
  }
  func.func @transform_2(%arg0: i32, %arg1: i32, %arg2: i32) -> (i32, i32) {
    %c0_i32 = arith.constant 0 : i32
    %c0_i32_0 = arith.constant 0 : i32
    return %c0_i32, %arg1 : i32, i32
  }
  func.func @transform_3(%arg0: i32, %arg1: i32, %arg2: i32) -> (i32, i32) {
    %c0_i32 = arith.constant 0 : i32
    return %arg0, %arg1 : i32, i32
  }
}

</mosaic_0001>

<bundles_post_ra>
// kernel: emotion_classifier_forward.18
= control target key start
LH: loop header
LB: loop body
LE: loop exit
PB: predicated region body
PF: predicated region fallthrough
CT: control target
= control target key end

     0   :  { %vm19_vm0 = vcmask 785408   ;;  %v151_v0 = vmov 0.0   ;;  %vm152_vm1 = vmmov 0   ;;  %vm47_vm2 = vcmask 261120   ;;  %s195_s1 = inlined_call_operand.vmem [shape: bf16[32,96], index: 1, kind: input, shape index: {}]   ;;  %s196_s0 = inlined_call_operand.vmem [shape: bf16[16,32], index: 0, kind: input, shape index: {}]   ;;  %s197_s2 = inlined_call_operand.vmem [shape: f32[1,96], index: 2, kind: input, shape index: {}]   ;;  %s198_s3 = inlined_call_operand.vmem [shape: bf16[16,96], index: 3, kind: output, shape index: {}]  }
   0x1   :  { %138 = vmatprep.subr.bf16.mxu0 %v151_v0  ;;  %v148_v1 = vld [vmem:[%s195_s1] sm:$0xff]   ;;  %142 = vmatprep.mubr.msk.bf16.mxu0 %vm152_vm1, %v151_v0  ;;  %20 = vst.msk [vmem:[#allocation2] sm:$0xff] %vm19_vm0, %v151_v0  ;;  %21 = vst.msk [vmem:[#allocation2 + $0x8] sm:$0xff] %vm19_vm0, %v151_v0  ;;  %v149_v2 = vld [vmem:[%s195_s1 + $0x8] sm:$0xff]   ;;  %vm119_vm3 = vcmask 781312  }
   0x2   :  { %139 = vmatpush3.bf16.msra.mxu0 %v148_v1  ;;  %v150_v3 = vld [vmem:[%s196_s0] sm:$0xff]  }
   0x3   :  { %140 = vmatprep.subr.bf16.mxu0 %v151_v0  ;;  %v130_v12 = vld [vmem:[%s197_s2] ss:$0 sm:$0xff] }
   0x6   :  { %141 = vmatpush3.bf16.msra.mxu0 %v149_v2 }
   0x8   :  { %v22_v4 = vld [vmem:[#allocation2] sm:$0xff]  ;;  %v23_v6 = vld [vmem:[#allocation2 + $0x8] sm:$0xff] }
   0x9   :  { %143 = vmatmul.mubr.msk.bf16.vlgmr.msra.gmra.mrb[0].mxu0 %vm47_vm2, %v150_v3 }
  0xdc   :  { %v85_v5 = vpop.f32.mrb[0].mxu0 }
  0xdd   :  { %v92_v7 = vadd.f32 %v85_v5, %v22_v4  ;;  %v144_v8 = vpop.f32.mrb[1].mxu0 }
  0xde   :  { %v88_v9 = vpop.f32.mrb[2].mxu0 }
  0xdf   :  { %95 = vst.msk [vmem:[#allocation2] sm:$0xff] %vm19_vm0, %v92_v7  ;;  %v93_v10 = vadd.f32 %v88_v9, %v23_v6  ;;  %v145_v11 = vpop.f32.mrb[3].mxu0 }
  0xe1   :  { %96 = vst.msk [vmem:[#allocation2 + $0x8] sm:$0xff] %vm19_vm0, %v93_v10 }
  0xe6   :  { %v100_v13 = vld [vmem:[#allocation2] sm:$0xff] }
  0xe7   :  { %v109_v14 = vadd.f32 %v130_v12, %v100_v13 }
  0xe8   :  { %v101_v15 = vld [vmem:[#allocation2 + $0x8] sm:$0xff] }
  0xe9   :  { %v133_v16 = vpack.c.bf16 %v109_v14, %v109_v14  ;;  %v110_v17 = vadd.f32 %v130_v12, %v101_v15 }
  0xeb   :  { %120 = vst.msk [vmem:[%s198_s3] sm:$0xf] %vm119_vm3, %v133_v16  ;;  %v134_v18 = vpack.c.bf16 %v110_v17, %v110_v17 }
  0xed   :  { %121 = vst.msk [vmem:[%s198_s3 + $0x4] sm:$0xf] %vm119_vm3, %v134_v18 }

// kernel: emotion_classifier_forward.17
= control target key start
LH: loop header
LB: loop body
LE: loop exit
PB: predicated region body
PF: predicated region fallthrough
CT: control target
= control target key end

     0   :  { %vm16_vm0 = vcmask 261120   ;;  %vm70_vm1 = vcmask 257024   ;;  %s129_s0 = inlined_call_operand.vmem [shape: f32[16,32], index: 0, kind: input, shape index: {}]   ;;  %s130_s1 = inlined_call_operand.vmem [shape: f32[1,32], index: 1, kind: input, shape index: {}]   ;;  %s131_s2 = inlined_call_operand.vmem [shape: f32[1,32], index: 2, kind: input, shape index: {}]   ;;  %s132_s3 = inlined_call_operand.vmem [shape: bf16[16,32], index: 3, kind: output, shape index: {}]  }
   0x1   :  { %v14_v0 = vld [vmem:[%s129_s0] sm:$0xff]  ;;  %v15_v1 = vld [vmem:[%s129_s0 + $0x8] sm:$0xff] }
   0x2   :  { %v17_v2 = vsel %vm16_vm0, %v14_v0, 0.0  ;;  %v20_v3 = vsel %vm16_vm0, %v15_v1, 0.0  ;;  %v77_v21 = vld [vmem:[%s130_s1] ss:$0 sm:$0xff] }
   0x3   :  { %18 = vadd.xlane.f32.xlu0 %v17_v2  ;;  %v78_v23 = vld [vmem:[%s131_s2] ss:$0 sm:$0xff] }
   0x7   :  { %21 = vadd.xlane.f32.xlu0 %v20_v3 }
  0x90   :  { %v19_v4 = vpop.xlane.xlu0 %18 }
  0x91   :  { %v24_v5 = vmul.f32 0.03125, %v19_v4 }
  0x93   :  { %v26_v6 = vsub.f32 %v14_v0, %v24_v5 }
  0x94   :  { %v22_v7 = vpop.xlane.xlu0 %21 }
  0x95   :  { %v25_v8 = vmul.f32 0.03125, %v22_v7  ;;  %v28_v9 = vmul.f32 %v26_v6, %v26_v6 }
  0x97   :  { %v27_v10 = vsub.f32 %v15_v1, %v25_v8  ;;  %v30_v11 = vsel %vm16_vm0, %v28_v9, 0.0 }
  0x98   :  { %31 = vadd.xlane.f32.xlu1 %v30_v11 }
  0x99   :  { %v29_v12 = vmul.f32 %v27_v10, %v27_v10 }
  0x9b   :  { %v33_v13 = vsel %vm16_vm0, %v29_v12, 0.0 }
  0x9c   :  { %34 = vadd.xlane.f32.xlu1 %v33_v13 }
 0x125   :  { %v32_v14 = vpop.xlane.xlu1 %31 }
 0x126   :  { %v36_v15 = vmul.f32 0.03125, %v32_v14 }
 0x128   :  { %v38_v16 = vadd.f32 1e-12, %v36_v15 }
 0x129   :  { %v35_v17 = vpop.xlane.xlu1 %34 }
 0x12a   :  { %83 = vrsqrt.f32 %v38_v16  ;;  %v37_v18 = vmul.f32 0.03125, %v35_v17 }
 0x12c   :  { %v39_v19 = vadd.f32 1e-12, %v37_v18 }
 0x12e   :  { %85 = vrsqrt.f32 %v39_v19 }
 0x134   :  { %v84_v20 = vpop.eup %83 }
 0x135   :  { %v42_v22 = vmul.f32 %v84_v20, %v26_v6 }
 0x137   :  { %v51_v24 = vmul.f32 %v77_v21, %v42_v22 }
 0x138   :  { %v86_v25 = vpop.eup %85 }
 0x139   :  { %v60_v26 = vadd.f32 %v78_v23, %v51_v24  ;;  %v43_v27 = vmul.f32 %v86_v25, %v27_v10 }
 0x13b   :  { %v81_v28 = vpack.c.bf16 %v60_v26, %v60_v26  ;;  %v52_v29 = vmul.f32 %v77_v21, %v43_v27 }
 0x13d   :  { %71 = vst.msk [vmem:[%s132_s3] sm:$0xf] %vm70_vm1, %v81_v28  ;;  %v61_v30 = vadd.f32 %v78_v23, %v52_v29 }
 0x13f   :  { %v82_v31 = vpack.c.bf16 %v61_v30, %v61_v30 }
 0x141   :  { %72 = vst.msk [vmem:[%s132_s3 + $0x4] sm:$0xf] %vm70_vm1, %v82_v31 }

// kernel: emotion_classifier_forward.20
= control target key start
LH: loop header
LB: loop body
LE: loop exit
PB: predicated region body
PF: predicated region fallthrough
CT: control target
= control target key end

     0   :  { %vm19_vm0 = vcmask 261120   ;;  %v150_v0 = vmov 0.0   ;;  %vm151_vm1 = vmmov 0   ;;  %vm118_vm2 = vcmask 257024   ;;  %s195_s1 = inlined_call_operand.vmem [shape: bf16[32,32], index: 1, kind: input, shape index: {}]   ;;  %s196_s0 = inlined_call_operand.vmem [shape: bf16[16,32], index: 0, kind: input, shape index: {}]   ;;  %s197_s2 = inlined_call_operand.vmem [shape: f32[1,32], index: 2, kind: input, shape index: {}]   ;;  %s198_s3 = inlined_call_operand.vmem [shape: bf16[16,32], index: 3, kind: output, shape index: {}]  }
   0x1   :  { %137 = vmatprep.subr.bf16.mxu0 %v150_v0  ;;  %v147_v1 = vld [vmem:[%s195_s1] sm:$0xff]   ;;  %141 = vmatprep.mubr.msk.bf16.mxu0 %vm151_vm1, %v150_v0  ;;  %20 = vst.msk [vmem:[#allocation2] sm:$0xff] %vm19_vm0, %v150_v0  ;;  %21 = vst.msk [vmem:[#allocation2 + $0x8] sm:$0xff] %vm19_vm0, %v150_v0  ;;  %v148_v2 = vld [vmem:[%s195_s1 + $0x8] sm:$0xff]  }
   0x2   :  { %138 = vmatpush3.bf16.msra.mxu0 %v147_v1  ;;  %v149_v3 = vld [vmem:[%s196_s0] sm:$0xff]  }
   0x3   :  { %139 = vmatprep.subr.bf16.mxu0 %v150_v0  ;;  %v129_v12 = vld [vmem:[%s197_s2] ss:$0 sm:$0xff] }
   0x6   :  { %140 = vmatpush3.bf16.msra.mxu0 %v148_v2 }
   0x8   :  { %v22_v4 = vld [vmem:[#allocation2] sm:$0xff]  ;;  %v23_v6 = vld [vmem:[#allocation2 + $0x8] sm:$0xff] }
   0x9   :  { %142 = vmatmul.mubr.msk.bf16.vlgmr.msra.gmra.mrb[0].mxu0 %vm19_vm0, %v149_v3 }
  0xdc   :  { %v85_v5 = vpop.f32.mrb[0].mxu0 }
  0xdd   :  { %v92_v7 = vadd.f32 %v85_v5, %v22_v4  ;;  %v143_v8 = vpop.f32.mrb[1].mxu0 }
  0xde   :  { %v88_v9 = vpop.f32.mrb[2].mxu0 }
  0xdf   :  { %94 = vst.msk [vmem:[#allocation2] sm:$0xff] %vm19_vm0, %v92_v7  ;;  %v93_v10 = vadd.f32 %v88_v9, %v23_v6  ;;  %v144_v11 = vpop.f32.mrb[3].mxu0 }
  0xe1   :  { %95 = vst.msk [vmem:[#allocation2 + $0x8] sm:$0xff] %vm19_vm0, %v93_v10 }
  0xe6   :  { %v99_v13 = vld [vmem:[#allocation2] sm:$0xff] }
  0xe7   :  { %v108_v14 = vadd.f32 %v129_v12, %v99_v13 }
  0xe8   :  { %v100_v15 = vld [vmem:[#allocation2 + $0x8] sm:$0xff] }
  0xe9   :  { %v132_v16 = vpack.c.bf16 %v108_v14, %v108_v14  ;;  %v109_v17 = vadd.f32 %v129_v12, %v100_v15 }
  0xeb   :  { %119 = vst.msk [vmem:[%s198_s3] sm:$0xf] %vm118_vm2, %v132_v16  ;;  %v133_v18 = vpack.c.bf16 %v109_v17, %v109_v17 }
  0xed   :  { %120 = vst.msk [vmem:[%s198_s3 + $0x4] sm:$0xf] %vm118_vm2, %v133_v18 }

// kernel: emotion_classifier_forward.21
= control target key start
LH: loop header
LB: loop body
LE: loop exit
PB: predicated region body
PF: predicated region fallthrough
CT: control target
= control target key end

     0   :  { %vm27_vm0 = vcmask 261120   ;;  %vm81_vm1 = vcmask 257024   ;;  %s153_s0 = inlined_call_operand.vmem [shape: bf16[16,32], index: 0, kind: input, shape index: {}]   ;;  %s154_s1 = inlined_call_operand.vmem [shape: bf16[16,32], index: 1, kind: input, shape index: {}]   ;;  %s155_s2 = inlined_call_operand.vmem [shape: f32[1,32], index: 2, kind: input, shape index: {}]   ;;  %s156_s3 = inlined_call_operand.vmem [shape: f32[1,32], index: 3, kind: input, shape index: {}]   ;;  %s157_s4 = inlined_call_operand.vmem [shape: bf16[16,32], index: 4, kind: output, shape index: {}]  }
   0x1   :  { %v95_v0 = vld [vmem:[%s153_s0] sm:$0xff]  }
   0x2   :  { %v99_v1 = vld [vmem:[%s154_s1] sm:$0xff]   ;;  %v96_v2 = vunpack.c.l.bf16 %v95_v0  ;;  %v97_v4 = vunpack.c.h.bf16 %v95_v0 }
   0x3   :  { %v100_v3 = vunpack.c.l.bf16 %v99_v1  ;;  %v101_v5 = vunpack.c.h.bf16 %v99_v1  ;;  %v88_v27 = vld [vmem:[%s155_s2] ss:$0 sm:$0xff] }
   0x4   :  { %v89_v29 = vld [vmem:[%s156_s3] ss:$0 sm:$0xff] }
   0x5   :  { %v25_v6 = vadd.f32 %v100_v3, %v96_v2  ;;  %v26_v7 = vadd.f32 %v101_v5, %v97_v4 }
   0x7   :  { %v28_v8 = vsel %vm27_vm0, %v25_v6, 0.0  ;;  %v31_v9 = vsel %vm27_vm0, %v26_v7, 0.0 }
   0x8   :  { %29 = vadd.xlane.f32.xlu0 %v28_v8 }
   0xc   :  { %32 = vadd.xlane.f32.xlu0 %v31_v9 }
  0x95   :  { %v30_v10 = vpop.xlane.xlu0 %29 }
  0x96   :  { %v35_v11 = vmul.f32 0.03125, %v30_v10 }
  0x98   :  { %v37_v12 = vsub.f32 %v25_v6, %v35_v11 }
  0x99   :  { %v33_v13 = vpop.xlane.xlu0 %32 }
  0x9a   :  { %v36_v14 = vmul.f32 0.03125, %v33_v13  ;;  %v39_v15 = vmul.f32 %v37_v12, %v37_v12 }
  0x9c   :  { %v38_v16 = vsub.f32 %v26_v7, %v36_v14  ;;  %v41_v17 = vsel %vm27_vm0, %v39_v15, 0.0 }
  0x9d   :  { %42 = vadd.xlane.f32.xlu1 %v41_v17 }
  0x9e   :  { %v40_v18 = vmul.f32 %v38_v16, %v38_v16 }
  0xa0   :  { %v44_v19 = vsel %vm27_vm0, %v40_v18, 0.0 }
  0xa1   :  { %45 = vadd.xlane.f32.xlu1 %v44_v19 }
 0x12a   :  { %v43_v20 = vpop.xlane.xlu1 %42 }
 0x12b   :  { %v47_v21 = vmul.f32 0.03125, %v43_v20 }
 0x12d   :  { %v49_v22 = vadd.f32 1e-12, %v47_v21 }
 0x12e   :  { %v46_v23 = vpop.xlane.xlu1 %45 }
 0x12f   :  { %102 = vrsqrt.f32 %v49_v22  ;;  %v48_v24 = vmul.f32 0.03125, %v46_v23 }
 0x131   :  { %v50_v25 = vadd.f32 1e-12, %v48_v24 }
 0x133   :  { %104 = vrsqrt.f32 %v50_v25 }
 0x139   :  { %v103_v26 = vpop.eup %102 }
 0x13a   :  { %v53_v28 = vmul.f32 %v103_v26, %v37_v12 }
 0x13c   :  { %v62_v30 = vmul.f32 %v88_v27, %v53_v28 }
 0x13d   :  { %v105_v31 = vpop.eup %104 }
 0x13e   :  { %v71_v32 = vadd.f32 %v89_v29, %v62_v30  ;;  %v54_v33 = vmul.f32 %v105_v31, %v38_v16 }
 0x140   :  { %v92_v34 = vpack.c.bf16 %v71_v32, %v71_v32  ;;  %v63_v35 = vmul.f32 %v88_v27, %v54_v33 }
 0x142   :  { %82 = vst.msk [vmem:[%s157_s4] sm:$0xf] %vm81_vm1, %v92_v34  ;;  %v72_v36 = vadd.f32 %v89_v29, %v63_v35 }
 0x144   :  { %v93_v37 = vpack.c.bf16 %v72_v36, %v72_v36 }
 0x146   :  { %83 = vst.msk [vmem:[%s157_s4 + $0x4] sm:$0xf] %vm81_vm1, %v93_v37 }

// kernel: emotion_classifier_forward.19
= control target key start
LH: loop header
LB: loop body
LE: loop exit
PB: predicated region body
PF: predicated region fallthrough
CT: control target
= control target key end

     0   :  { %s948_s15 = smov 0   ;;  %s1032_s0 = inlined_call_operand.vmem [shape: bf16[2,4,8,8], index: 0, kind: input, shape index: {}]   ;;  %s1033_s1 = inlined_call_operand.vmem [shape: bf16[2,4,8,8], index: 1, kind: input, shape index: {}]   ;;  %s1034_s2 = inlined_call_operand.vmem [shape: bf16[2,4,8,8], index: 2, kind: input, shape index: {}]   ;;  %s1035_s3 = inlined_call_operand.vmem [shape: f32[2,1,8], index: 3, kind: input, shape index: {}]   ;;  %s1036_s4 = inlined_call_operand.vmem [shape: bf16[2,4,8,8], index: 4, kind: output, shape index: {}]  }
   0x1 LB: > { %s795_s16 = sadd.s32 4294967295, %s919_s15   ;;  %p799_p0 = scmp.ge.s32.totalorder %s919_s15, 1  ;;  %s919_s15 = sphi %s948_s15, %s14_s15  }
   0x2   : > { %p190_p1 = scmp.lt.s32.totalorder %s919_s15, 3 }
   0x4   : > { %p191_p2 = pnand %p799_p0, %p190_p1 }
   0x5   : > { %p229_p3 = scmp.lt.s32.totalorder (!%p191_p2), %s795_s16, 1  ;;  %v921_v0 = vmov (!%p191_p2), 0.0   ;;  %vm922_vm0 = vmmov (!%p191_p2), 0   ;;  %vm265_vm1 = vcmask (!%p191_p2), 64512   ;;  %vm516_vm2 = vcmask (!%p191_p2), 1043456  }
   0x6   : > { %194 = sbr.rel (%p191_p2) target bundleno = 784 (0x310), region = 36  ;;  %839 = vmatprep.subr.bf16.mxu0 (!%p191_p2), %v921_v0  ;;  %845 = vmatprep.subr.bf16.mxu1 (!%p191_p2), %v921_v0  ;;  %vm702_vm3 = vcmask (!%p191_p2), 60416  }
   0x7   : > { %841 = vmatprep.mubr.msk.bf16.mxu0 (!%p191_p2), %vm922_vm0, %v921_v0  ;;  %847 = vmatprep.mubr.msk.bf16.mxu1 (!%p191_p2), %vm922_vm0, %v921_v0 }
   0xd   : > { %s1038_s16 = smov (!%p229_p3, %s795_s16), 1 }
   0xe   : > { %s965_s17 = sshll.u32 %s1038_s16, 4  ;;  %s246_s26 = scalar_lea.vmem %s1035_s3, %s1038_s16 }
   0xf   : > { %s238_s20 = scalar_lea.vmem %s1033_s1, %s965_s17  ;;  %s233_s23 = scalar_lea.vmem %s1032_s0, %s965_s17  ;;  %v812_v15 = vld [vmem:[%s246_s26] ss:$0 sm:$0xff] }
  0x10   : > { %v257_v1 = vld [vmem:[%s238_s20] sm:$0xf]  ;;  %v258_v2 = vld [vmem:[%s238_s20 + $0x4] sm:$0xf]  ;;  %v259_v5 = vld [vmem:[%s238_s20 + $0x8] sm:$0xf]  ;;  %s243_s29 = scalar_lea.vmem %s1034_s2, %s965_s17  ;;  %s251_s6 = scalar_lea.vmem %s1036_s4, %s965_s17 }
  0x11   : > { %v270_v3 = vsel %vm265_vm1, %v257_v1, 0  ;;  %v316_v4 = vsel %vm265_vm1, %v258_v2, 0  ;;  %v260_v6 = vld [vmem:[%s238_s20 + $0xc] sm:$0xf]  ;;  %v253_v7 = vld [vmem:[%s233_s23] sm:$0xf] }
  0x12   : > { %840 = vmatpush3.bf16.xpose.msra.mxu0 %v270_v3  ;;  %846 = vmatpush3.bf16.xpose.msra.mxu1 %v316_v4  ;;  %v254_v8 = vld [vmem:[%s233_s23 + $0x4] sm:$0xf]  ;;  %v362_v9 = vsel %vm265_vm1, %v259_v5, 0  ;;  %v408_v10 = vsel %vm265_vm1, %v260_v6, 0  ;;  %v255_v11 = vld [vmem:[%s233_s23 + $0x8] sm:$0xf] }
  0x13   : > { %851 = vmatprep.subr.bf16.mxu0 %v921_v0  ;;  %857 = vmatprep.subr.bf16.mxu1 %v921_v0  ;;  %v256_v12 = vld [vmem:[%s233_s23 + $0xc] sm:$0xf]  ;;  %v261_v62 = vld [vmem:[%s243_s29] sm:$0xf]  ;;  %v262_v1 = vld [vmem:[%s243_s29 + $0x4] sm:$0xf] }
  0x14   : > { %v518_v63 = vsel %vm516_vm2, %v261_v62, 0  ;;  %v564_v2 = vsel %vm516_vm2, %v262_v1, 0  ;;  %v263_v3 = vld [vmem:[%s243_s29 + $0x8] sm:$0xf]  ;;  %v264_v5 = vld [vmem:[%s243_s29 + $0xc] sm:$0xf] }
  0x15   : > { %v610_v4 = vsel %vm516_vm2, %v263_v3, 0  ;;  %v656_v6 = vsel %vm516_vm2, %v264_v5, 0 }
  0x19   : > { %842 = vmatmul.mubr.msk.bf16.vlgmr.msra.gmra.mrb[0].mxu0 %vm265_vm1, %v253_v7  ;;  %848 = vmatmul.mubr.msk.bf16.vlgmr.msra.gmra.mrb[0].mxu1 %vm265_vm1, %v254_v8 }
  0x1a   : > { %852 = vmatpush3.bf16.xpose.msra.mxu0 %v362_v9  ;;  %858 = vmatpush3.bf16.xpose.msra.mxu1 %v408_v10 }
  0x1b   : > { %853 = vmatprep.mubr.msk.bf16.mxu0 %vm922_vm0, %v921_v0  ;;  %859 = vmatprep.mubr.msk.bf16.mxu1 %vm922_vm0, %v921_v0 }
  0x1c   : > { %863 = vmatprep.subr.bf16.mxu0 %v921_v0  ;;  %869 = vmatprep.subr.bf16.mxu1 %v921_v0 }
  0x21   : > { %854 = vmatmul.mubr.msk.bf16.vlgmr.msra.gmra.mrb[4].mxu0 %vm265_vm1, %v255_v11  ;;  %860 = vmatmul.mubr.msk.bf16.vlgmr.msra.gmra.mrb[4].mxu1 %vm265_vm1, %v256_v12 }
  0x22   : > { %865 = vmatprep.mubr.msk.bf16.mxu0 %vm922_vm0, %v921_v0  ;;  %871 = vmatprep.mubr.msk.bf16.mxu1 %vm922_vm0, %v921_v0 }
  0x23   : > { %864 = vmatpush3.bf16.msra.mxu0 %v518_v63  ;;  %870 = vmatpush3.bf16.msra.mxu1 %v564_v2 }
  0x24   : > { %875 = vmatprep.subr.bf16.mxu0 %v921_v0  ;;  %881 = vmatprep.subr.bf16.mxu1 %v921_v0 }
  0xec   : > { %v306_v13 = vpop.f32.mrb[0].mxu0  ;;  %v352_v14 = vpop.f32.mrb[0].mxu1 }
  0xed   : > { %v450_v16 = vmul.f32 0.35355338, %v306_v13  ;;  %v843_v17 = vpop.f32.mrb[1].mxu0  ;;  %v451_v18 = vmul.f32 0.35355338, %v352_v14  ;;  %v849_v19 = vpop.f32.mrb[1].mxu1 }
  0xee   : > { %v309_v20 = vpop.f32.mrb[2].mxu0  ;;  %v355_v21 = vpop.f32.mrb[2].mxu1 }
  0xef   : > { %v844_v22 = vpop.f32.mrb[3].mxu0  ;;  %v850_v23 = vpop.f32.mrb[3].mxu1  ;;  %v461_v24 = vadd.f32 %v812_v15, %v450_v16  ;;  %v462_v25 = vadd.f32 %v812_v15, %v451_v18 }
  0xf1   : > { %v465_v26 = vsel %vm265_vm1, %v461_v24, -inf  ;;  %v468_v27 = vsel %vm265_vm1, %v462_v25, -inf }
  0xf2   : > { %466 = vmax.xlane.f32.xlu0 %v465_v26 }
  0xf4   : > { %v398_v28 = vpop.f32.mrb[4].mxu0  ;;  %v444_v29 = vpop.f32.mrb[4].mxu1 }
  0xf5   : > { %v452_v30 = vmul.f32 0.35355338, %v398_v28  ;;  %v855_v31 = vpop.f32.mrb[5].mxu0  ;;  %v453_v32 = vmul.f32 0.35355338, %v444_v29  ;;  %v861_v33 = vpop.f32.mrb[5].mxu1 }
  0xf6   : > { %469 = vmax.xlane.f32.xlu0 %v468_v27  ;;  %v401_v34 = vpop.f32.mrb[6].mxu0  ;;  %v447_v35 = vpop.f32.mrb[6].mxu1 }
  0xf7   : > { %v856_v36 = vpop.f32.mrb[7].mxu0  ;;  %v862_v37 = vpop.f32.mrb[7].mxu1  ;;  %v463_v38 = vadd.f32 %v812_v15, %v452_v30  ;;  %v464_v39 = vadd.f32 %v812_v15, %v453_v32 }
  0xf9   : > { %v471_v40 = vsel %vm265_vm1, %v463_v38, -inf  ;;  %v474_v41 = vsel %vm265_vm1, %v464_v39, -inf }
  0xfa   : > { %472 = vmax.xlane.f32.xlu1 %v471_v40 }
  0xfe   : > { %475 = vmax.xlane.f32.xlu1 %v474_v41 }
 0x17f   : > { %v467_v42 = vpop.xlane.xlu0 %466 }
 0x180   : > { %v477_v43 = vsub.f32 %v461_v24, %v467_v42 }
 0x182   : > { %v481_v44 = vmul.f32 1.442695, %v477_v43 }
 0x183   : > { %v470_v45 = vpop.xlane.xlu0 %469 }
 0x184   : > { %897 = vpow2.f32 %v481_v44  ;;  %v478_v46 = vsub.f32 %v462_v25, %v470_v45 }
 0x186   : > { %v483_v47 = vmul.f32 1.442695, %v478_v46 }
 0x187   : > { %v473_v48 = vpop.xlane.xlu1 %472 }
 0x188   : > { %899 = vpow2.f32 %v483_v47  ;;  %v479_v49 = vsub.f32 %v463_v38, %v473_v48 }
 0x18a   : > { %v485_v50 = vmul.f32 1.442695, %v479_v49 }
 0x18b   : > { %v476_v51 = vpop.xlane.xlu1 %475 }
 0x18c   : > { %901 = vpow2.f32 %v485_v50  ;;  %v480_v52 = vsub.f32 %v464_v39, %v476_v51 }
 0x18e   : > { %v898_v53 = vpop.eup %897  ;;  %v487_v54 = vmul.f32 1.442695, %v480_v52 }
 0x18f   : > { %v489_v55 = vsel %vm265_vm1, %v898_v53, 0.0 }
 0x190   : > { %903 = vpow2.f32 %v487_v54  ;;  %490 = vadd.xlane.f32.xlu0 %v489_v55 }
 0x192   : > { %v900_v56 = vpop.eup %899 }
 0x193   : > { %v492_v57 = vsel %vm265_vm1, %v900_v56, 0.0 }
 0x194   : > { %493 = vadd.xlane.f32.xlu1 %v492_v57 }
 0x196   : > { %v902_v58 = vpop.eup %901 }
 0x197   : > { %v495_v59 = vsel %vm265_vm1, %v902_v58, 0.0 }
 0x198   : > { %496 = vadd.xlane.f32.xlu0 %v495_v59 }
 0x19a   : > { %v904_v60 = vpop.eup %903 }
 0x19b   : > { %v498_v61 = vsel %vm265_vm1, %v904_v60, 0.0 }
 0x19c   : > { %499 = vadd.xlane.f32.xlu1 %v498_v61 }
 0x21d   : > { %v491_v7 = vpop.xlane.xlu0 %490 }
 0x21e   : > { %905 = vrcp.f32 %v491_v7 }
 0x221   : > { %v494_v8 = vpop.xlane.xlu1 %493 }
 0x222   : > { %907 = vrcp.f32 %v494_v8 }
 0x225   : > { %v497_v9 = vpop.xlane.xlu0 %496 }
 0x226   : > { %909 = vrcp.f32 %v497_v9 }
 0x228   : > { %v906_v10 = vpop.eup %905 }
 0x229   : > { %v505_v11 = vmul.f32 %v906_v10, %v898_v53  ;;  %v500_v12 = vpop.xlane.xlu1 %499 }
 0x22a   : > { %911 = vrcp.f32 %v500_v12 }
 0x22b   : > { %v509_v13 = vpack.c.bf16 %v505_v11, %v505_v11 }
 0x22c   : > { %v908_v14 = vpop.eup %907 }
 0x22d   : > { %v506_v15 = vmul.f32 %v908_v14, %v900_v56  ;;  %866 = vmatmul.mubr.msk.bf16.vlgmr.msra.gmra.mrb[8].mxu0 %vm265_vm1, %v509_v13 }
 0x22e   : > { %876 = vmatpush3.bf16.msra.mxu0 %v610_v4  ;;  %877 = vmatprep.mubr.msk.bf16.mxu0 %vm922_vm0, %v921_v0 }
 0x22f   : > { %v510_v16 = vpack.c.bf16 %v506_v15, %v506_v15 }
 0x230   : > { %v910_v17 = vpop.eup %909 }
 0x231   : > { %v507_v18 = vmul.f32 %v910_v17, %v902_v58  ;;  %872 = vmatmul.mubr.msk.bf16.vlgmr.msra.gmra.mrb[8].mxu1 %vm265_vm1, %v510_v16 }
 0x232   : > { %882 = vmatpush3.bf16.msra.mxu1 %v656_v6  ;;  %883 = vmatprep.mubr.msk.bf16.mxu1 %vm922_vm0, %v921_v0 }
 0x233   : > { %v511_v19 = vpack.c.bf16 %v507_v18, %v507_v18 }
 0x234   : > { %v912_v20 = vpop.eup %911 }
 0x235   : > { %v508_v21 = vmul.f32 %v912_v20, %v904_v60  ;;  %878 = vmatmul.mubr.msk.bf16.vlgmr.msra.gmra.mrb[12].mxu0 %vm265_vm1, %v511_v19 }
 0x237   : > { %v512_v22 = vpack.c.bf16 %v508_v21, %v508_v21 }
 0x239   : > { %884 = vmatmul.mubr.msk.bf16.vlgmr.msra.gmra.mrb[12].mxu1 %vm265_vm1, %v512_v22 }
 0x300   : > { %v554_v23 = vpop.f32.mrb[8].mxu0 }
 0x301   : > { %v698_v24 = vpack.c.bf16 %v554_v23, %v554_v23  ;;  %v867_v25 = vpop.f32.mrb[9].mxu0 }
 0x302   : > { %v557_v26 = vpop.f32.mrb[10].mxu0 }
 0x303   : > { %703 = vst.msk [vmem:[%s251_s6] sm:$0xf] %vm702_vm3, %v698_v24  ;;  %v868_v0 = vpop.f32.mrb[11].mxu0 }
 0x304   : > { %v600_v27 = vpop.f32.mrb[8].mxu1 }
 0x305   : > { %v699_v28 = vpack.c.bf16 %v600_v27, %v600_v27  ;;  %v873_v29 = vpop.f32.mrb[9].mxu1 }
 0x306   : > { %v603_v30 = vpop.f32.mrb[10].mxu1 }
 0x307   : > { %704 = vst.msk [vmem:[%s251_s6 + $0x4] sm:$0xf] %vm702_vm3, %v699_v28  ;;  %v874_v31 = vpop.f32.mrb[11].mxu1 }
 0x308   : > { %v646_v32 = vpop.f32.mrb[12].mxu0 }
 0x309   : > { %v700_v33 = vpack.c.bf16 %v646_v32, %v646_v32  ;;  %v879_v34 = vpop.f32.mrb[13].mxu0 }
 0x30a   : > { %v649_v35 = vpop.f32.mrb[14].mxu0 }
 0x30b   : > { %705 = vst.msk [vmem:[%s251_s6 + $0x8] sm:$0xf] %vm702_vm3, %v700_v33  ;;  %v880_v36 = vpop.f32.mrb[15].mxu0 }
 0x30c   : > { %v692_v37 = vpop.f32.mrb[12].mxu1 }
 0x30d   : > { %v701_v38 = vpack.c.bf16 %v692_v37, %v692_v37  ;;  %v885_v39 = vpop.f32.mrb[13].mxu1 }
 0x30e   : > { %v695_v40 = vpop.f32.mrb[14].mxu1 }
 0x30f   : > { %706 = vst.msk [vmem:[%s251_s6 + $0xc] sm:$0xf] %vm702_vm3, %v701_v38  ;;  %v886_v41 = vpop.f32.mrb[15].mxu1 }
 0x310 PF: > { %s14_s15 = sadd.s32 1, %s919_s15  }
 0x311   : > { %p11_p4 = scmp.ge.s32.totalorder %s14_s15, 4  }
 0x313   :  { %13 = sbr.rel (!%p11_p4) target bundleno = 1 (0x1), region = 75 }

// kernel: emotion_classifier_forward.22
= control target key start
LH: loop header
LB: loop body
LE: loop exit
PB: predicated region body
PF: predicated region fallthrough
CT: control target
= control target key end

     0   :  { %vm19_vm0 = vcmask 523264   ;;  %v173_v0 = vmov 0.0   ;;  %vm174_vm1 = vmmov 0   ;;  %vm47_vm2 = vcmask 261120   ;;  %s217_s1 = inlined_call_operand.vmem [shape: bf16[32,64], index: 1, kind: input, shape index: {}]   ;;  %s218_s0 = inlined_call_operand.vmem [shape: bf16[16,32], index: 0, kind: input, shape index: {}]   ;;  %s219_s2 = inlined_call_operand.vmem [shape: f32[1,64], index: 2, kind: input, shape index: {}]   ;;  %s220_s3 = inlined_call_operand.vmem [shape: bf16[16,64], index: 3, kind: output, shape index: {}]  }
   0x1   :  { %156 = vmatprep.subr.bf16.mxu0 %v173_v0  ;;  %v166_v1 = vld [vmem:[%s217_s1] sm:$0xff]   ;;  %160 = vmatprep.mubr.msk.bf16.mxu0 %vm174_vm1, %v173_v0  ;;  %20 = vst.msk [vmem:[#allocation2] sm:$0xff] %vm19_vm0, %v173_v0  ;;  %21 = vst.msk [vmem:[#allocation2 + $0x8] sm:$0xff] %vm19_vm0, %v173_v0  ;;  %v167_v2 = vld [vmem:[%s217_s1 + $0x8] sm:$0xff]   ;;  %vm137_vm3 = vcmask 519168  }
   0x2   :  { %157 = vmatpush3.bf16.msra.mxu0 %v166_v1  ;;  %v168_v3 = vld [vmem:[%s218_s0] sm:$0xff]  }
   0x3   :  { %158 = vmatprep.subr.bf16.mxu0 %v173_v0  ;;  %v148_v12 = vld [vmem:[%s219_s2] ss:$0 sm:$0xff] }
   0x6   :  { %159 = vmatpush3.bf16.msra.mxu0 %v167_v2 }
   0x8   :  { %v22_v4 = vld [vmem:[#allocation2] sm:$0xff]  ;;  %v23_v6 = vld [vmem:[#allocation2 + $0x8] sm:$0xff] }
   0x9   :  { %161 = vmatmul.mubr.msk.bf16.vlgmr.msra.gmra.mrb[0].mxu0 %vm47_vm2, %v168_v3 }
  0xdc   :  { %v85_v5 = vpop.f32.mrb[0].mxu0 }
  0xdd   :  { %v92_v7 = vadd.f32 %v85_v5, %v22_v4  ;;  %v162_v8 = vpop.f32.mrb[1].mxu0 }
  0xde   :  { %v88_v9 = vpop.f32.mrb[2].mxu0 }
  0xdf   :  { %95 = vst.msk [vmem:[#allocation2] sm:$0xff] %vm19_vm0, %v92_v7  ;;  %v93_v10 = vadd.f32 %v88_v9, %v23_v6  ;;  %v163_v11 = vpop.f32.mrb[3].mxu0 }
  0xe1   :  { %96 = vst.msk [vmem:[#allocation2 + $0x8] sm:$0xff] %vm19_vm0, %v93_v10 }
  0xe6   :  { %v100_v13 = vld [vmem:[#allocation2] sm:$0xff] }
  0xe7   :  { %v109_v14 = vadd.f32 %v148_v12, %v100_v13 }
  0xe8   :  { %v101_v15 = vld [vmem:[#allocation2 + $0x8] sm:$0xff] }
  0xe9   :  { %v111_v16 = vmul.f32 %v109_v14, %v109_v14  ;;  %v110_v17 = vadd.f32 %v148_v12, %v101_v15 }
  0xeb   :  { %v113_v18 = vmul.f32 %v111_v16, %v109_v14  ;;  %v112_v19 = vmul.f32 %v110_v17, %v110_v17 }
  0xed   :  { %v115_v20 = vmul.f32 0.044715, %v113_v18  ;;  %v114_v21 = vmul.f32 %v112_v19, %v110_v17 }
  0xef   :  { %v117_v22 = vadd.f32 %v115_v20, %v109_v14  ;;  %v116_v23 = vmul.f32 0.044715, %v114_v21 }
  0xf1   :  { %v119_v24 = vmul.f32 0.7978846, %v117_v22  ;;  %v118_v25 = vadd.f32 %v116_v23, %v110_v17 }
  0xf3   :  { %169 = vtanh.f32 %v119_v24  ;;  %v120_v26 = vmul.f32 0.7978846, %v118_v25 }
  0xf5   :  { %171 = vtanh.f32 %v120_v26 }
  0xfd   :  { %v170_v27 = vpop.eup %169 }
  0xfe   :  { %v123_v28 = vadd.f32 1.0, %v170_v27 }
  0xff   :  { %v172_v29 = vpop.eup %171 }
 0x100   :  { %v125_v30 = vmul.f32 0.5, %v123_v28  ;;  %v124_v31 = vadd.f32 1.0, %v172_v29 }
 0x102   :  { %v127_v32 = vmul.f32 %v125_v30, %v109_v14  ;;  %v126_v33 = vmul.f32 0.5, %v124_v31 }
 0x104   :  { %v151_v34 = vpack.c.bf16 %v127_v32, %v127_v32  ;;  %v128_v35 = vmul.f32 %v126_v33, %v110_v17 }
 0x106   :  { %138 = vst.msk [vmem:[%s220_s3] sm:$0xf] %vm137_vm3, %v151_v34  ;;  %v152_v36 = vpack.c.bf16 %v128_v35, %v128_v35 }
 0x108   :  { %139 = vst.msk [vmem:[%s220_s3 + $0x4] sm:$0xf] %vm137_vm3, %v152_v36 }

// kernel: emotion_classifier_forward.23
= control target key start
LH: loop header
LB: loop body
LE: loop exit
PB: predicated region body
PF: predicated region fallthrough
CT: control target
= control target key end

     0   :  { %vm19_vm0 = vcmask 261120   ;;  %v177_v0 = vmov 0.0   ;;  %vm178_vm1 = vmmov 0   ;;  %vm63_vm2 = vcmask 523264   ;;  %s227_s1 = inlined_call_operand.vmem [shape: bf16[64,32], index: 1, kind: input, shape index: {}]   ;;  %s228_s0 = inlined_call_operand.vmem [shape: bf16[16,64], index: 0, kind: input, shape index: {}]   ;;  %s229_s2 = inlined_call_operand.vmem [shape: f32[1,32], index: 2, kind: input, shape index: {}]   ;;  %s230_s3 = inlined_call_operand.vmem [shape: bf16[16,32], index: 3, kind: output, shape index: {}]  }
   0x1   :  { %158 = vmatprep.subr.bf16.mxu0 %v177_v0  ;;  %v172_v1 = vld [vmem:[%s227_s1] sm:$0xff]   ;;  %166 = vmatprep.mubr.msk.bf16.mxu0 %vm178_vm1, %v177_v0  ;;  %20 = vst.msk [vmem:[#allocation2] sm:$0xff] %vm19_vm0, %v177_v0  ;;  %21 = vst.msk [vmem:[#allocation2 + $0x8] sm:$0xff] %vm19_vm0, %v177_v0  ;;  %v173_v2 = vld [vmem:[%s227_s1 + $0x8] sm:$0xff]   ;;  %vm135_vm3 = vcmask 257024  }
   0x2   :  { %159 = vmatpush3.bf16.msra.mxu0 %v172_v1  ;;  %v174_v3 = vld [vmem:[%s227_s1 + $0x10] sm:$0xff]   ;;  %v175_v4 = vld [vmem:[%s227_s1 + $0x18] sm:$0xff]   ;;  %v176_v5 = vld [vmem:[%s228_s0] sm:$0xff]  }
   0x3   :  { %160 = vmatprep.subr.bf16.mxu0 %v177_v0  ;;  %v148_v14 = vld [vmem:[%s229_s2] ss:$0 sm:$0xff] }
   0x6   :  { %161 = vmatpush3.bf16.msra.mxu0 %v173_v2 }
   0x7   :  { %162 = vmatprep.subr.bf16.mxu0 %v177_v0 }
   0x8   :  { %v22_v6 = vld [vmem:[#allocation2] sm:$0xff]  ;;  %v23_v8 = vld [vmem:[#allocation2 + $0x8] sm:$0xff] }
   0xa   :  { %163 = vmatpush3.bf16.msra.mxu0 %v174_v3 }
   0xb   :  { %164 = vmatprep.subr.bf16.mxu0 %v177_v0 }
   0xe   :  { %165 = vmatpush3.bf16.msra.mxu0 %v175_v4 }
  0x11   :  { %167 = vmatmul.mubr.msk.bf16.vlgmr.msra.gmra.mrb[0].mxu0 %vm63_vm2, %v176_v5 }
  0xe4   :  { %v101_v7 = vpop.f32.mrb[0].mxu0 }
  0xe5   :  { %v108_v9 = vadd.f32 %v101_v7, %v22_v6  ;;  %v168_v10 = vpop.f32.mrb[1].mxu0 }
  0xe6   :  { %v104_v11 = vpop.f32.mrb[2].mxu0 }
  0xe7   :  { %111 = vst.msk [vmem:[#allocation2] sm:$0xff] %vm19_vm0, %v108_v9  ;;  %v109_v12 = vadd.f32 %v104_v11, %v23_v8  ;;  %v169_v13 = vpop.f32.mrb[3].mxu0 }
  0xe9   :  { %112 = vst.msk [vmem:[#allocation2 + $0x8] sm:$0xff] %vm19_vm0, %v109_v12 }
  0xee   :  { %v116_v15 = vld [vmem:[#allocation2] sm:$0xff] }
  0xef   :  { %v125_v16 = vadd.f32 %v148_v14, %v116_v15 }
  0xf0   :  { %v117_v17 = vld [vmem:[#allocation2 + $0x8] sm:$0xff] }
  0xf1   :  { %v151_v18 = vpack.c.bf16 %v125_v16, %v125_v16  ;;  %v126_v19 = vadd.f32 %v148_v14, %v117_v17 }
  0xf3   :  { %136 = vst.msk [vmem:[%s230_s3] sm:$0xf] %vm135_vm3, %v151_v18  ;;  %v152_v20 = vpack.c.bf16 %v126_v19, %v126_v19 }
  0xf5   :  { %137 = vst.msk [vmem:[%s230_s3 + $0x4] sm:$0xf] %vm135_vm3, %v152_v20 }

// kernel: emotion_classifier_forward.33
= control target key start
LH: loop header
LB: loop body
LE: loop exit
PB: predicated region body
PF: predicated region fallthrough
CT: control target
= control target key end

     0   :  { %v158_v1 = vmov 0.0   ;;  %vm159_vm0 = vmmov 0   ;;  %vm20_vm1 = vcmask 25600   ;;  %s208_s0 = inlined_call_operand.vmem [shape: bf16[2,32], index: 0, kind: input, shape index: {}]   ;;  %s209_s1 = inlined_call_operand.vmem [shape: bf16[32,4], index: 1, kind: input, shape index: {}]   ;;  %s210_s2 = inlined_call_operand.vmem [shape: f32[1,4], index: 2, kind: input, shape index: {}]   ;;  %s211_s3 = inlined_call_operand.hbm [shape: f32[2,4], index: 3, kind: output, shape index: {}]  }
   0x1   :  { %v132_v0 = vld [vmem:[%s209_s1] sm:$0xff]   ;;  %121 = vmatprep.subr.bf16.mxu0 %v158_v1  ;;  %v133_v2 = vld [vmem:[%s209_s1 + $0x8] sm:$0xff]   ;;  %125 = vmatprep.mubr.msk.bf16.mxu0 %vm159_vm0, %v158_v1 }
   0x2   :  { %122 = vmatpush3.bf16.msra.mxu0 %v132_v0 }
   0x3   :  { %8 = vsyncpa [#allocation4], 0  ;;  %123 = vmatprep.subr.bf16.mxu0 %v158_v1  ;;  %21 = vst.msk [vmem:[#allocation2] sm:$0x3] %vm20_vm1, %v158_v1  ;;  %v23_v3 = vld [vmem:[%s208_s0] sm:$0x1] }
   0x4   :  { %vm40_vm2 = vcmask 261120   ;;  %v117_v10 = vld [vmem:[%s210_s2] ss:$0 sm:$0xff]  ;;  %s160_s19 = smov [#allocation3]  }
   0x5   :  { %s106_s20 = sshll.u32 %s160_s19, 4  ;;  %s107_s20 = int_to_ptr.vmem [resolvable:$true] %s106_s20 }
   0x6   :  { %124 = vmatpush3.bf16.msra.mxu0 %v133_v2  ;;  %s134_s0 = scalar_lea.vmem %s107_s20, 32  ;;  %p139_p1 = scmp.lt.s32.totalorder %s107_s20, %s107_s20 }
   0x7   :  { %p135_p0 = scmp.ne.s32.totalorder %s107_s20, %s134_s0  ;;  %p140_p2 = scmp.lt.s32.totalorder %s134_s0, %s134_s0 }
   0x9   :  { %126 = vmatmul.mubr.msk.bf16.vlgmr.msra.gmra.mrb[0].mxu0 %vm40_vm2, %v23_v3  ;;  %p141_p3 = por %p140_p2, %p139_p1 }
   0xa   :  { %v22_v4 = vld [vmem:[#allocation2] sm:$0x3] }
   0xb   :  { %p142_p4 = pnand %p141_p3, %p135_p0 }
  0xdc   :  { %v78_v5 = vpop.f32.mrb[0].mxu0 }
  0xdd   :  { %v84_v6 = vadd.f32 %v78_v5, %v22_v4  ;;  %v127_v7 = vpop.f32.mrb[1].mxu0 }
  0xde   :  { %v81_v8 = vpop.f32.mrb[2].mxu0 }
  0xdf   :  { %86 = vst.msk [vmem:[#allocation2] sm:$0x3] %vm20_vm1, %v84_v6  ;;  %v128_v9 = vpop.f32.mrb[3].mxu0 }
  0xe6   :  { %v90_v11 = vld [vmem:[#allocation2] sm:$0x3] }
  0xe7   :  { %v98_v12 = vadd.f32 %v117_v10, %v90_v11 }
  0xe9   :  { %99 = vst.msk [vmem:[#allocation3] sm:$0x3] %vm20_vm1, %v98_v12 }
  0xea   :  { %145 = shalt.err (!%p142_p4)
}
  0xeb   :  { %s146_s23 = scalar_lea.hbm %s211_s3, 32 }
  0xec   :  { %p147_p5 = scmp.ne.s32.totalorder %s211_s3, %s146_s23  ;;  %p150_p6 = scmp.lt.u32.totalorder %s146_s23, %s211_s3 }
  0xee   :  { %p152_p7 = pnand %p150_p6, %p147_p5 }
  0xf0   :  { %155 = shalt.err (!%p152_p7)
}
  0xf1   :  { %109 = dma.vmem_to_hbm [thread:$0]  %s107_s20, 32, %s211_s3, [#allocation4]  }
  0xf2   :  { %156 = dma.done.wait [#allocation4], 32  }
  0xf3   :  { %157 = vsyncadd [#allocation4], 4294967264 }
  0xf4   :  { %113 = vsyncpa [#allocation4], 1 }

// kernel: emotion_classifier_forward.32
= control target key start
LH: loop header
LB: loop body
LE: loop exit
PB: predicated region body
PF: predicated region fallthrough
CT: control target
= control target key end

     0   :  { %vm19_vm0 = vcmask 254976   ;;  %v127_v0 = vmov 0.0   ;;  %vm128_vm1 = vmmov 0   ;;  %vm39_vm2 = vcmask 261120   ;;  %s166_s1 = inlined_call_operand.vmem [shape: bf16[32,32], index: 1, kind: input, shape index: {}]   ;;  %s167_s0 = inlined_call_operand.vmem [shape: bf16[2,32], index: 0, kind: input, shape index: {}]   ;;  %s168_s2 = inlined_call_operand.vmem [shape: f32[1,32], index: 2, kind: input, shape index: {}]   ;;  %s169_s3 = inlined_call_operand.vmem [shape: bf16[2,32], index: 3, kind: output, shape index: {}]  }
   0x1   :  { %20 = vst.msk [vmem:[#allocation2] sm:$0x3] %vm19_vm0, %v127_v0  ;;  %113 = vmatprep.subr.bf16.mxu0 %v127_v0  ;;  %v123_v1 = vld [vmem:[%s166_s1] sm:$0xff]   ;;  %117 = vmatprep.mubr.msk.bf16.mxu0 %vm128_vm1, %v127_v0  ;;  %v124_v2 = vld [vmem:[%s166_s1 + $0x8] sm:$0xff]   ;;  %vm100_vm3 = vcmask 253952  }
   0x2   :  { %114 = vmatpush3.bf16.msra.mxu0 %v123_v1  ;;  %v22_v3 = vld [vmem:[%s167_s0] sm:$0x1] }
   0x3   :  { %115 = vmatprep.subr.bf16.mxu0 %v127_v0  ;;  %v109_v10 = vld [vmem:[%s168_s2] ss:$0 sm:$0xff] }
   0x6   :  { %116 = vmatpush3.bf16.msra.mxu0 %v124_v2 }
   0x8   :  { %v21_v4 = vld [vmem:[#allocation2] sm:$0x3] }
   0x9   :  { %118 = vmatmul.mubr.msk.bf16.vlgmr.msra.gmra.mrb[0].mxu0 %vm39_vm2, %v22_v3 }
  0xdc   :  { %v77_v5 = vpop.f32.mrb[0].mxu0 }
  0xdd   :  { %v83_v6 = vadd.f32 %v77_v5, %v21_v4  ;;  %v119_v7 = vpop.f32.mrb[1].mxu0 }
  0xde   :  { %v80_v8 = vpop.f32.mrb[2].mxu0 }
  0xdf   :  { %85 = vst.msk [vmem:[#allocation2] sm:$0x3] %vm19_vm0, %v83_v6  ;;  %v120_v9 = vpop.f32.mrb[3].mxu0 }
  0xe6   :  { %v89_v11 = vld [vmem:[#allocation2] sm:$0x3] }
  0xe7   :  { %v97_v12 = vadd.f32 %v109_v10, %v89_v11 }
  0xe9   :  { %125 = vtanh.f32 %v97_v12 }
  0xf3   :  { %v126_v13 = vpop.eup %125 }
  0xf4   :  { %v99_v14 = vpack.c.bf16 %v126_v13, %v126_v13 }
  0xf6   :  { %101 = vst.msk [vmem:[%s169_s3] sm:$0x1] %vm100_vm3, %v99_v14 }

</bundles_post_ra>
